<compile_context>
chip_gen: v7x
topology: tpu7x:2x2x1
jax: 0.10.0
libtpu: 0.0.40
codegen_flags: <defaults>
</compile_context>

<pallas_src>
import jax
import jax.numpy as jnp
from jax.experimental import pallas as pl
from jax.experimental.pallas import tpu as pltpu

D_PPG = 500          # samples per PPG signal
D_H1 = 512
D_H2 = 256
D_OUT = 2


def _round_up(n, m):
    return ((n + m - 1) // m) * m


def _mlp_kernel(xc_ref, xt_ref, w1c_ref, w1t_ref, b1_ref,
                w2_ref, b2_ref, w3_ref, b3_ref, o_ref):
    # Cast the raw input tiles to bf16 in-kernel (VPU) for the MXU dots.
    xc = xc_ref[...].astype(jnp.bfloat16)
    xt = xt_ref[...].astype(jnp.bfloat16)

    # Layer 1: concat-free — split contraction over the calib/target halves,
    # accumulate in f32 on the MXU (K=500 is zero-masked by the compiler).
    h1 = jnp.dot(xc, w1c_ref[...], preferred_element_type=jnp.float32)
    h1 = h1 + jnp.dot(xt, w1t_ref[...], preferred_element_type=jnp.float32)
    h1 = jnp.maximum(h1 + b1_ref[...], 0.0)          # bias + ReLU in f32

    # Dropout(0.2) -> identity in eval mode.
    h2 = jnp.dot(h1.astype(jnp.bfloat16), w2_ref[...],
                 preferred_element_type=jnp.float32)
    h2 = jnp.maximum(h2 + b2_ref[...], 0.0)

    y = jnp.dot(h2.astype(jnp.bfloat16), w3_ref[...],
                preferred_element_type=jnp.float32)
    o_ref[...] = (y + b3_ref[...]).astype(o_ref.dtype)   # (TB, 2) f32 store


def prepare_params(params):
    """One-time weight prep (hoisted out of the per-call forward path).

    Splits W1 into its calibration / target halves (removes the runtime
    concat) and casts the matmul weights to bf16.  Biases stay f32.
    """
    w1, b1, w2, b2, w3, b3 = params            # w* stored transposed: (in, out)
    w1c = w1[:D_PPG].astype(jnp.bfloat16)      # (500, 512)
    w1t = w1[D_PPG:].astype(jnp.bfloat16)      # (500, 512)
    return (w1c, w1t, b1,
            w2.astype(jnp.bfloat16), b2,
            w3.astype(jnp.bfloat16), b3)


def _pick_batch_tile(B, batch_tile):
    if B <= 256:
        # Tiny/small batches: a single tile, 8-row (sublane) granularity.
        return min(_round_up(B, 8), 256)
    # Large batches: big tiles to amortize per-grid-step overhead, but keep
    # at least 2 grid steps so both v7x TensorCores get work.
    half = _round_up(pl.cdiv(B, 2), 128)
    return max(128, min(batch_tile, half))


def paired_ppg2bp_forward(ppg_c, ppg_t, prepared, *, batch_tile=512):
    """ppg_c, ppg_t: (B, 500) float32 (or bfloat16). Returns (B, 2) float32.

    `prepared` must come from prepare_params() (done once, outside the hot path).
    """
    w1c, w1t, b1, w2, b2, w3, b3 = prepared
    B = ppg_c.shape[0]

    TB = _pick_batch_tile(B, batch_tile)
    nb = pl.cdiv(B, TB)

    # Weights/biases: constant index_map -> DMA'd once, resident in VMEM.
    resident = lambda shape: pl.BlockSpec(shape, lambda i: (0,) * len(shape))
    x_spec = pl.BlockSpec((TB, D_PPG), lambda i: (i, 0))

    out = pl.pallas_call(
        _mlp_kernel,
        out_shape=jax.ShapeDtypeStruct((B, D_OUT), jnp.float32),
        grid=(nb,),
        in_specs=[
            x_spec,                           # ppg_c tile (raw dtype)
            x_spec,                           # ppg_t tile (raw dtype)
            resident((D_PPG, D_H1)),          # W1 (calib half, bf16)
            resident((D_PPG, D_H1)),          # W1 (target half, bf16)
            resident((1, D_H1)),              # b1 (f32)
            resident((D_H1, D_H2)),           # W2 (bf16)
            resident((1, D_H2)),              # b2 (f32)
            resident((D_H2, D_OUT)),          # W3 (bf16)
            resident((1, D_OUT)),             # b3 (f32)
        ],
        out_specs=pl.BlockSpec((TB, D_OUT), lambda i: (i, 0)),
        compiler_params=pltpu.CompilerParams(
            dimension_semantics=("parallel",)),
    )(ppg_c, ppg_t, w1c, w1t, b1, w2, b2, w3, b3)

    return out


def init_params(key):
    """Deterministic init mimicking PyTorch Linear default U(-1/sqrt(fan_in), +)."""
    ks = jax.random.split(key, 6)

    def linear(kw, kb, fan_in, fan_out):
        bound = 1.0 / jnp.sqrt(fan_in)
        w = jax.random.uniform(kw, (fan_in, fan_out), jnp.float32, -bound, bound)
        b = jax.random.uniform(kb, (1, fan_out), jnp.float32, -bound, bound)
        return w, b

    w1, b1 = linear(ks[0], ks[1], 2 * D_PPG, D_H1)
    w2, b2 = linear(ks[2], ks[3], D_H1, D_H2)
    w3, b3 = linear(ks[4], ks[5], D_H2, D_OUT)
    return (w1, b1, w2, b2, w3, b3)


def _reference(ppg_c, ppg_t, params):
    """Pure-JAX reference mirroring the kernel's bf16-operand / f32-accum math."""
    w1, b1, w2, b2, w3, b3 = params
    x = jnp.concatenate([ppg_c, ppg_t], axis=1).astype(jnp.bfloat16)
    h1 = jnp.dot(x, w1.astype(jnp.bfloat16), preferred_element_type=jnp.float32) + b1
    h1 = jnp.maximum(h1, 0.0)
    h2 = jnp.dot(h1.astype(jnp.bfloat16), w2.astype(jnp.bfloat16),
                 preferred_element_type=jnp.float32) + b2
    h2 = jnp.maximum(h2, 0.0)
    return jnp.dot(h2.astype(jnp.bfloat16), w3.astype(jnp.bfloat16),
                   preferred_element_type=jnp.float32) + b3


if __name__ == "__main__":
    key = jax.random.PRNGKey(0)
    k_params, k_c, k_t = jax.random.split(key, 3)

    B = 8  # small batch (latency case; large B uses the parallel batch grid)
    params = init_params(k_params)
    prepared = prepare_params(params)          # one-time weight prep
    ppg_c = jax.random.normal(k_c, (B, D_PPG), jnp.float32)
    ppg_t = jax.random.normal(k_t, (B, D_PPG), jnp.float32)

    out = paired_ppg2bp_forward(ppg_c, ppg_t, prepared)
    out = jax.block_until_ready(out)

    ref = _reference(ppg_c, ppg_t, params)
    assert out.shape == (B, D_OUT)
    assert jnp.allclose(out, ref, atol=2e-3, rtol=2e-3), "mismatch vs JAX reference"

    print("KERNEL_OK")
</pallas_src>

<mosaic_0001>
module attributes {stable_mosaic.version = 11 : i64} {
  func.func @_mlp_kernel(%arg0: i32, %arg1: memref<8x500xf32, #tpu.memory_space<vmem>>, %arg2: memref<8x500xf32, #tpu.memory_space<vmem>>, %arg3: memref<500x512xbf16, #tpu.memory_space<vmem>>, %arg4: memref<500x512xbf16, #tpu.memory_space<vmem>>, %arg5: memref<1x512xf32, #tpu.memory_space<vmem>>, %arg6: memref<512x256xbf16, #tpu.memory_space<vmem>>, %arg7: memref<1x256xf32, #tpu.memory_space<vmem>>, %arg8: memref<256x2xbf16, #tpu.memory_space<vmem>>, %arg9: memref<1x2xf32, #tpu.memory_space<vmem>>, %arg10: memref<8x2xf32, #tpu.memory_space<vmem>>) attributes {dimension_semantics = [#tpu.dimension_semantics<parallel>], iteration_bounds = array<i64: 1>, scalar_prefetch = 0 : i64, scratch_operands = 0 : i64, tpu.core_type = #tpu.core_type<tc>, window_params = [{transform_indices = @transform_0, window_bounds = array<i64: 8, 500>}, {transform_indices = @transform_1, window_bounds = array<i64: 8, 500>}, {pipeline_mode = #tpu.pipeline_mode<synchronous>, transform_indices = @transform_2, window_bounds = array<i64: 500, 512>}, {pipeline_mode = #tpu.pipeline_mode<synchronous>, transform_indices = @transform_3, window_bounds = array<i64: 500, 512>}, {pipeline_mode = #tpu.pipeline_mode<synchronous>, transform_indices = @transform_4, window_bounds = array<i64: 1, 512>}, {pipeline_mode = #tpu.pipeline_mode<synchronous>, transform_indices = @transform_5, window_bounds = array<i64: 512, 256>}, {pipeline_mode = #tpu.pipeline_mode<synchronous>, transform_indices = @transform_6, window_bounds = array<i64: 1, 256>}, {pipeline_mode = #tpu.pipeline_mode<synchronous>, transform_indices = @transform_7, window_bounds = array<i64: 256, 2>}, {pipeline_mode = #tpu.pipeline_mode<synchronous>, transform_indices = @transform_8, window_bounds = array<i64: 1, 2>}, {transform_indices = @transform_9, window_bounds = array<i64: 8, 2>}]} {
    %c0 = arith.constant 0 : index
    %c0_0 = arith.constant 0 : index
    %0 = vector.load %arg1[%c0, %c0_0] : memref<8x500xf32, #tpu.memory_space<vmem>>, vector<8x500xf32>
    %1 = arith.truncf %0 : vector<8x500xf32> to vector<8x500xbf16>
    %c0_1 = arith.constant 0 : index
    %c0_2 = arith.constant 0 : index
    %2 = vector.load %arg2[%c0_1, %c0_2] : memref<8x500xf32, #tpu.memory_space<vmem>>, vector<8x500xf32>
    %3 = arith.truncf %2 : vector<8x500xf32> to vector<8x500xbf16>
    %c0_3 = arith.constant 0 : index
    %c0_4 = arith.constant 0 : index
    %4 = vector.load %arg3[%c0_3, %c0_4] : memref<500x512xbf16, #tpu.memory_space<vmem>>, vector<500x512xbf16>
    %cst = arith.constant dense<0.000000e+00> : vector<8x512xf32>
    %5 = tpu.matmul %1, %4, %cst {dimension_numbers = #tpu.dot_dimension_numbers<[1], [0], [0], [1], [0, 0, 1, 1], [], []>} : vector<8x500xbf16>, vector<500x512xbf16>, vector<8x512xf32> -> vector<8x512xf32>
    %c0_5 = arith.constant 0 : index
    %c0_6 = arith.constant 0 : index
    %6 = vector.load %arg4[%c0_5, %c0_6] : memref<500x512xbf16, #tpu.memory_space<vmem>>, vector<500x512xbf16>
    %cst_7 = arith.constant dense<0.000000e+00> : vector<8x512xf32>
    %7 = tpu.matmul %3, %6, %cst_7 {dimension_numbers = #tpu.dot_dimension_numbers<[1], [0], [0], [1], [0, 0, 1, 1], [], []>} : vector<8x500xbf16>, vector<500x512xbf16>, vector<8x512xf32> -> vector<8x512xf32>
    %8 = arith.addf %5, %7 : vector<8x512xf32>
    %c0_8 = arith.constant 0 : index
    %c0_9 = arith.constant 0 : index
    %9 = vector.load %arg5[%c0_8, %c0_9] : memref<1x512xf32, #tpu.memory_space<vmem>>, vector<1x512xf32>
    %10 = vector.broadcast %9 : vector<1x512xf32> to vector<8x512xf32>
    %11 = arith.addf %8, %10 : vector<8x512xf32>
    %cst_10 = arith.constant 0.000000e+00 : f32
    %12 = vector.broadcast %cst_10 : f32 to vector<8x512xf32>
    %13 = arith.maximumf %11, %12 : vector<8x512xf32>
    %14 = arith.truncf %13 : vector<8x512xf32> to vector<8x512xbf16>
    %c0_11 = arith.constant 0 : index
    %c0_12 = arith.constant 0 : index
    %15 = vector.load %arg6[%c0_11, %c0_12] : memref<512x256xbf16, #tpu.memory_space<vmem>>, vector<512x256xbf16>
    %cst_13 = arith.constant dense<0.000000e+00> : vector<8x256xf32>
    %16 = tpu.matmul %14, %15, %cst_13 {dimension_numbers = #tpu.dot_dimension_numbers<[1], [0], [0], [1], [0, 0, 1, 1], [], []>} : vector<8x512xbf16>, vector<512x256xbf16>, vector<8x256xf32> -> vector<8x256xf32>
    %c0_14 = arith.constant 0 : index
    %c0_15 = arith.constant 0 : index
    %17 = vector.load %arg7[%c0_14, %c0_15] : memref<1x256xf32, #tpu.memory_space<vmem>>, vector<1x256xf32>
    %18 = vector.broadcast %17 : vector<1x256xf32> to vector<8x256xf32>
    %19 = arith.addf %16, %18 : vector<8x256xf32>
    %cst_16 = arith.constant 0.000000e+00 : f32
    %20 = vector.broadcast %cst_16 : f32 to vector<8x256xf32>
    %21 = arith.maximumf %19, %20 : vector<8x256xf32>
    %22 = arith.truncf %21 : vector<8x256xf32> to vector<8x256xbf16>
    %c0_17 = arith.constant 0 : index
    %c0_18 = arith.constant 0 : index
    %23 = vector.load %arg8[%c0_17, %c0_18] : memref<256x2xbf16, #tpu.memory_space<vmem>>, vector<256x2xbf16>
    %cst_19 = arith.constant dense<0.000000e+00> : vector<8x2xf32>
    %24 = tpu.matmul %22, %23, %cst_19 {dimension_numbers = #tpu.dot_dimension_numbers<[1], [0], [0], [1], [0, 0, 1, 1], [], []>} : vector<8x256xbf16>, vector<256x2xbf16>, vector<8x2xf32> -> vector<8x2xf32>
    %c0_20 = arith.constant 0 : index
    %c0_21 = arith.constant 0 : index
    %25 = vector.load %arg9[%c0_20, %c0_21] : memref<1x2xf32, #tpu.memory_space<vmem>>, vector<1x2xf32>
    %26 = vector.broadcast %25 : vector<1x2xf32> to vector<8x2xf32>
    %27 = arith.addf %24, %26 : vector<8x2xf32>
    %c0_22 = arith.constant 0 : index
    %c0_23 = arith.constant 0 : index
    %28 = vector.load %arg10[%c0_22, %c0_23] : memref<8x2xf32, #tpu.memory_space<vmem>>, vector<8x2xf32>
    tpu.vector_store %arg10[%c0_22, %c0_23], %27 {strides = array<i32>} : memref<8x2xf32, #tpu.memory_space<vmem>>, vector<8x2xf32>,
    return
  }
  func.func @transform_0(%arg0: i32) -> (i32, i32) {
    %c0_i32 = arith.constant 0 : i32
    %c0_i32_0 = arith.constant 0 : i32
    return %arg0, %c0_i32 : i32, i32
  }
  func.func @transform_1(%arg0: i32) -> (i32, i32) {
    %c0_i32 = arith.constant 0 : i32
    %c0_i32_0 = arith.constant 0 : i32
    return %arg0, %c0_i32 : i32, i32
  }
  func.func @transform_2(%arg0: i32) -> (i32, i32) {
    %c0_i32 = arith.constant 0 : i32
    %c0_i32_0 = arith.constant 0 : i32
    %c0_i32_1 = arith.constant 0 : i32
    return %c0_i32, %c0_i32_0 : i32, i32
  }
  func.func @transform_3(%arg0: i32) -> (i32, i32) {
    %c0_i32 = arith.constant 0 : i32
    %c0_i32_0 = arith.constant 0 : i32
    %c0_i32_1 = arith.constant 0 : i32
    return %c0_i32, %c0_i32_0 : i32, i32
  }
  func.func @transform_4(%arg0: i32) -> (i32, i32) {
    %c0_i32 = arith.constant 0 : i32
    %c0_i32_0 = arith.constant 0 : i32
    %c0_i32_1 = arith.constant 0 : i32
    return %c0_i32, %c0_i32_0 : i32, i32
  }
  func.func @transform_5(%arg0: i32) -> (i32, i32) {
    %c0_i32 = arith.constant 0 : i32
    %c0_i32_0 = arith.constant 0 : i32
    %c0_i32_1 = arith.constant 0 : i32
    return %c0_i32, %c0_i32_0 : i32, i32
  }
  func.func @transform_6(%arg0: i32) -> (i32, i32) {
    %c0_i32 = arith.constant 0 : i32
    %c0_i32_0 = arith.constant 0 : i32
    %c0_i32_1 = arith.constant 0 : i32
    return %c0_i32, %c0_i32_0 : i32, i32
  }
  func.func @transform_7(%arg0: i32) -> (i32, i32) {
    %c0_i32 = arith.constant 0 : i32
    %c0_i32_0 = arith.constant 0 : i32
    %c0_i32_1 = arith.constant 0 : i32
    return %c0_i32, %c0_i32_0 : i32, i32
  }
  func.func @transform_8(%arg0: i32) -> (i32, i32) {
    %c0_i32 = arith.constant 0 : i32
    %c0_i32_0 = arith.constant 0 : i32
    %c0_i32_1 = arith.constant 0 : i32
    return %c0_i32, %c0_i32_0 : i32, i32
  }
  func.func @transform_9(%arg0: i32) -> (i32, i32) {
    %c0_i32 = arith.constant 0 : i32
    %c0_i32_0 = arith.constant 0 : i32
    return %arg0, %c0_i32 : i32, i32
  }
}

</mosaic_0001>

<bundles_post_ra>
// kernel: tpu_custom_call.1
= control target key start
LH: loop header
LB: loop body
LE: loop exit
PB: predicated region body
PF: predicated region fallthrough
CT: control target
= control target key end

     0   :  { %14 = vsyncpa [#allocation3], 0  ;;  %s3861_s0 = inlined_call_operand.vmem [shape: f32[8,500], index: 0, kind: input, shape index: {}]   ;;  %s3862_s1 = inlined_call_operand.vmem [shape: f32[8,500], index: 1, kind: input, shape index: {}]   ;;  %s3863_s2 = inlined_call_operand.hbm [shape: bf16[500,512], index: 2, kind: input, shape index: {}]   ;;  %s3864_s3 = inlined_call_operand.hbm [shape: bf16[500,512], index: 3, kind: input, shape index: {}]   ;;  %s3865_s4 = inlined_call_operand.vmem [shape: f32[1,512], index: 4, kind: input, shape index: {}]   ;;  %s3866_s5 = inlined_call_operand.hbm [shape: bf16[512,256], index: 5, kind: input, shape index: {}]   ;;  %s3867_s6 = inlined_call_operand.vmem [shape: f32[1,256], index: 6, kind: input, shape index: {}]   ;;  %s3868_s7 = inlined_call_operand.vmem [shape: bf16[256,2], index: 7, kind: input, shape index: {}]   ;;  %s3869_s8 = inlined_call_operand.vmem [shape: f32[1,2], index: 8, kind: input, shape index: {}]   ;;  %s3870_s9 = inlined_call_operand.vmem [shape: f32[8,2], index: 9, kind: output, shape index: {}]  }
   0x1   :  { %15 = vsyncpa [#allocation5], 0  ;;  %s3603_s30 = smov [#allocation4]   ;;  %s3604_s11 = smov [#allocation2]  }
   0x2   :  { %s37_s10 = sshll.u32 %s3603_s30, 4  ;;  %s25_s12 = sshll.u32 %s3604_s11, 4  ;;  %s38_s10 = int_to_ptr.vmem [resolvable:$true] %s37_s10  ;;  %s3660_s12 = int_to_ptr.vmem [resolvable:$true] %s25_s12 }
   0x3   :  { %s3533_s15 = scalar_lea.hbm %s3864_s3, 16128 }
   0x4   :  { %p3534_p0 = scmp.ne.s32.totalorder %s3864_s3, %s3533_s15  ;;  %p3537_p1 = scmp.lt.u32.totalorder %s3533_s15, %s3864_s3 }
   0x6   :  { %p3539_p2 = pnand %p3537_p1, %p3534_p0 }
   0x8   :  { %3542 = shalt.err (!%p3539_p2)
}
   0x9   :  { %s3543_s20 = scalar_lea.vmem %s38_s10, 16128  ;;  %p3548_p4 = scmp.lt.s32.totalorder %s38_s10, %s38_s10 }
   0xa   :  { %p3544_p3 = scmp.ne.s32.totalorder %s38_s10, %s3543_s20  ;;  %p3549_p5 = scmp.lt.s32.totalorder %s3543_s20, %s3543_s20 }
   0xc   :  { %p3550_p6 = por %p3549_p5, %p3548_p4 }
   0xe   :  { %p3551_p7 = pnand %p3550_p6, %p3544_p3 }
  0x10   :  { %3554 = shalt.err (!%p3551_p7)
}
  0x11   :  { %s3605_s21 = smov 256   ;;  %s3606_s22 = smov 16  }
  0x12   :  { %43 = dma.hbm_to_vmem [thread:$0]  %s3864_s3, 16128, %s38_s10, [#allocation5], %s3605_s21, %s3605_s21, %s3606_s22  }
  0x13   :  { %s3555_s27 = scalar_lea.hbm %s3863_s2, 16128 }
  0x14   :  { %p3556_p8 = scmp.ne.s32.totalorder %s3863_s2, %s3555_s27  ;;  %p3559_p9 = scmp.lt.u32.totalorder %s3555_s27, %s3863_s2 }
  0x16   :  { %p3561_p10 = pnand %p3559_p9, %p3556_p8 }
  0x18   :  { %3564 = shalt.err (!%p3561_p10)
}
  0x19   :  { %s3565_s13 = scalar_lea.vmem %s3660_s12, 16128  ;;  %p3570_p12 = scmp.lt.s32.totalorder %s3660_s12, %s3660_s12 }
  0x1a   :  { %p3566_p11 = scmp.ne.s32.totalorder %s3660_s12, %s3565_s13  ;;  %p3571_p13 = scmp.lt.s32.totalorder %s3565_s13, %s3565_s13 }
  0x1c   :  { %p3572_p0 = por %p3571_p13, %p3570_p12 }
  0x1e   :  { %p3573_p1 = pnand %p3572_p0, %p3566_p11 }
  0x20   :  { %3576 = shalt.err (!%p3573_p1)
}
  0x21   :  { %31 = dma.hbm_to_vmem [thread:$0]  %s3863_s2, 16128, %s3660_s12, [#allocation3], %s3605_s21, %s3605_s21, %s3606_s22  }
  0x22   :  { %s3607_s14 = smov [#allocation6]   ;;  %s3577_s18 = scalar_lea.hbm %s3866_s5, 8192 }
  0x23   :  { %s51_s15 = sshll.u32 %s3607_s14, 4  ;;  %p3578_p2 = scmp.ne.s32.totalorder %s3866_s5, %s3577_s18  ;;  %s52_s15 = int_to_ptr.vmem [resolvable:$true] %s51_s15 }
  0x24   :  { %p3581_p3 = scmp.lt.u32.totalorder %s3577_s18, %s3866_s5 }
  0x26   :  { %p3583_p4 = pnand %p3581_p3, %p3578_p2 }
  0x28   :  { %3586 = shalt.err (!%p3583_p4)
}
  0x29   :  { %s3587_s25 = scalar_lea.vmem %s52_s15, 8192  ;;  %p3592_p6 = scmp.lt.s32.totalorder %s52_s15, %s52_s15 }
  0x2a   :  { %p3588_p5 = scmp.ne.s32.totalorder %s52_s15, %s3587_s25  ;;  %p3593_p7 = scmp.lt.s32.totalorder %s3587_s25, %s3587_s25 }
  0x2c   :  { %p3594_p8 = por %p3593_p7, %p3592_p6 }
  0x2e   :  { %p3595_p9 = pnand %p3594_p8, %p3588_p5 }
  0x30   :  { %3598 = shalt.err (!%p3595_p9)
}
  0x31   :  { %s3608_s2 = smov 128   ;;  %s3609_s12 = smov 8  }
  0x32   :  { %57 = dma.hbm_to_vmem [thread:$0]  %s3866_s5, 8192, %s52_s15, [#allocation5], %s3608_s2, %s3608_s2, %s3609_s12  }
  0x33   :  { %3599 = dma.done.wait [#allocation3], 16128  }
  0x34   :  { %3600 = vsyncadd [#allocation3], 4294951168 }
  0x35   :  { %3601 = dma.done.wait [#allocation5], 24320  }
  0x36   :  { %3602 = vsyncadd [#allocation5], 4294942976  ;;  %v3041_v0 = vld [vmem:[#allocation4 + $0x4] ss:$16 sps:$4 sm:$0xff]   ;;  %v3043_v1 = vld [vmem:[#allocation4] ss:$16 sps:$4 sm:$0xff]  }
  0x37   :  { %989 = vmatprep.subr.bf16.mxu1 %v3041_v0  ;;  %v3044_v2 = vld [vmem:[#allocation4 + $0xc] ss:$16 sps:$4 sm:$0xff]   ;;  %v3046_v3 = vld [vmem:[#allocation4 + $0x8] ss:$16 sps:$4 sm:$0xff]   ;;  %v3047_v4 = vld [vmem:[#allocation4 + $0x24] ss:$16 sps:$4 sm:$0xff]  }
  0x38   :  { %990 = vmatpush1.bf16.msra.mxu1 %v3043_v1  ;;  %v3049_v5 = vld [vmem:[#allocation4 + $0x20] ss:$16 sps:$4 sm:$0xff]   ;;  %1071 = vmatprep.subr.bf16.mxu0 %v3044_v2  ;;  %v3050_v6 = vld [vmem:[#allocation4 + $0x2c] ss:$16 sps:$4 sm:$0xff]   ;;  %v3052_v7 = vld [vmem:[#allocation4 + $0x28] ss:$16 sps:$4 sm:$0xff]  }
  0x39   :  { %1072 = vmatpush1.bf16.msra.mxu0 %v3046_v3  ;;  %991 = vmatprep.subr.bf16.mxu1 %v3047_v4  ;;  %v3053_v8 = vld [vmem:[#allocation4 + $0x44] ss:$16 sps:$4 sm:$0xff]   ;;  %v3055_v9 = vld [vmem:[#allocation4 + $0x40] ss:$16 sps:$4 sm:$0xff]   ;;  %v3056_v10 = vld [vmem:[#allocation4 + $0x4c] ss:$16 sps:$4 sm:$0xff]  }
  0x3a   :  { %1073 = vmatprep.subr.bf16.mxu0 %v3050_v6  ;;  %v3059_v11 = vld [vmem:[#allocation4 + $0x64] ss:$16 sps:$4 sm:$0xff]   ;;  %v3058_v12 = vld [vmem:[#allocation4 + $0x48] ss:$16 sps:$4 sm:$0xff]   ;;  %v3062_v13 = vld [vmem:[#allocation4 + $0x6c] ss:$16 sps:$4 sm:$0xff]  }
  0x3b   :  { %v3061_v14 = vld [vmem:[#allocation4 + $0x60] ss:$16 sps:$4 sm:$0xff]   ;;  %v3065_v15 = vld [vmem:[#allocation4 + $0x84] ss:$16 sps:$4 sm:$0xff]   ;;  %v3064_v16 = vld [vmem:[#allocation4 + $0x68] ss:$16 sps:$4 sm:$0xff]  }
  0x3c   :  { %992 = vmatpush1.bf16.msra.mxu1 %v3049_v5  ;;  %v3068_v17 = vld [vmem:[#allocation4 + $0x8c] ss:$16 sps:$4 sm:$0xff]   ;;  %v3067_v18 = vld [vmem:[#allocation4 + $0x80] ss:$16 sps:$4 sm:$0xff]   ;;  %v3071_v19 = vld [vmem:[#allocation4 + $0xa4] ss:$16 sps:$4 sm:$0xff]  }
  0x3d   :  { %993 = vmatprep.subr.bf16.mxu1 %v3053_v8  ;;  %1074 = vmatpush1.bf16.msra.mxu0 %v3052_v7  ;;  %v3070_v20 = vld [vmem:[#allocation4 + $0x88] ss:$16 sps:$4 sm:$0xff]   ;;  %v3074_v21 = vld [vmem:[#allocation4 + $0xac] ss:$16 sps:$4 sm:$0xff]   ;;  %v3073_v22 = vld [vmem:[#allocation4 + $0xa0] ss:$16 sps:$4 sm:$0xff]  }
  0x3e   :  { %1075 = vmatprep.subr.bf16.mxu0 %v3056_v10  ;;  %v3077_v23 = vld [vmem:[#allocation4 + $0xc4] ss:$16 sps:$4 sm:$0xff]   ;;  %v3076_v24 = vld [vmem:[#allocation4 + $0xa8] ss:$16 sps:$4 sm:$0xff]   ;;  %v3080_v25 = vld [vmem:[#allocation4 + $0xcc] ss:$16 sps:$4 sm:$0xff]  }
  0x3f   :  { %v3079_v26 = vld [vmem:[#allocation4 + $0xc0] ss:$16 sps:$4 sm:$0xff]   ;;  %v3083_v27 = vld [vmem:[#allocation4 + $0xe4] ss:$16 sps:$4 sm:$0xff]   ;;  %v3082_v28 = vld [vmem:[#allocation4 + $0xc8] ss:$16 sps:$4 sm:$0xff]  }
  0x40   :  { %994 = vmatpush1.bf16.msra.mxu1 %v3055_v9  ;;  %v3086_v29 = vld [vmem:[#allocation4 + $0xec] ss:$16 sps:$4 sm:$0xff]   ;;  %v3085_v30 = vld [vmem:[#allocation4 + $0xe0] ss:$16 sps:$4 sm:$0xff]   ;;  %v3089_v31 = vld [vmem:[#allocation4 + $0x104] ss:$16 sps:$4 sm:$0xff]  }
  0x41   :  { %995 = vmatprep.subr.bf16.mxu1 %v3059_v11  ;;  %1076 = vmatpush1.bf16.msra.mxu0 %v3058_v12  ;;  %v3088_v32 = vld [vmem:[#allocation4 + $0xe8] ss:$16 sps:$4 sm:$0xff]   ;;  %v3092_v33 = vld [vmem:[#allocation4 + $0x10c] ss:$16 sps:$4 sm:$0xff]   ;;  %v3091_v34 = vld [vmem:[#allocation4 + $0x100] ss:$16 sps:$4 sm:$0xff]  }
  0x42   :  { %1077 = vmatprep.subr.bf16.mxu0 %v3062_v13  ;;  %v3095_v35 = vld [vmem:[#allocation4 + $0x124] ss:$16 sps:$4 sm:$0xff]   ;;  %v3094_v36 = vld [vmem:[#allocation4 + $0x108] ss:$16 sps:$4 sm:$0xff]   ;;  %v3098_v37 = vld [vmem:[#allocation4 + $0x12c] ss:$16 sps:$4 sm:$0xff]  }
  0x43   :  { %v3097_v38 = vld [vmem:[#allocation4 + $0x120] ss:$16 sps:$4 sm:$0xff]   ;;  %v3101_v39 = vld [vmem:[#allocation4 + $0x144] ss:$16 sps:$4 sm:$0xff]   ;;  %v3100_v40 = vld [vmem:[#allocation4 + $0x128] ss:$16 sps:$4 sm:$0xff]  }
  0x44   :  { %996 = vmatpush1.bf16.msra.mxu1 %v3061_v14  ;;  %v3104_v41 = vld [vmem:[#allocation4 + $0x14c] ss:$16 sps:$4 sm:$0xff]   ;;  %v3103_v42 = vld [vmem:[#allocation4 + $0x140] ss:$16 sps:$4 sm:$0xff]   ;;  %v3107_v43 = vld [vmem:[#allocation4 + $0x164] ss:$16 sps:$4 sm:$0xff]  }
  0x45   :  { %997 = vmatprep.subr.bf16.mxu1 %v3065_v15  ;;  %1078 = vmatpush1.bf16.msra.mxu0 %v3064_v16  ;;  %v3106_v44 = vld [vmem:[#allocation4 + $0x148] ss:$16 sps:$4 sm:$0xff]   ;;  %v3110_v45 = vld [vmem:[#allocation4 + $0x16c] ss:$16 sps:$4 sm:$0xff]   ;;  %v3109_v47 = vld [vmem:[#allocation4 + $0x160] ss:$16 sps:$4 sm:$0xff]  }
  0x46   :  { %1079 = vmatprep.subr.bf16.mxu0 %v3068_v17  ;;  %v83_v46 = vld [vmem:[%s3862_s1 + $0x8] sm:$0xff]  ;;  %v3113_v49 = vld [vmem:[#allocation4 + $0x184] ss:$16 sps:$4 sm:$0xff]   ;;  %v3115_v52 = vld [vmem:[#allocation4 + $0x180] ss:$16 sps:$4 sm:$0xff]   ;;  %vm972_vm0 = vcmask 949248  }
  0x47   :  { %v87_v48 = vpack.c.bf16 %v83_v46, %v83_v46  ;;  %v3112_v50 = vld [vmem:[#allocation4 + $0x168] ss:$16 sps:$4 sm:$0xff]   ;;  %v3116_v51 = vld [vmem:[#allocation4 + $0x18c] ss:$16 sps:$4 sm:$0xff]   ;;  %v3119_v53 = vld [vmem:[#allocation4 + $0x1a4] ss:$16 sps:$4 sm:$0xff]  }
  0x48   :  { %998 = vmatpush1.bf16.msra.mxu1 %v3067_v18  ;;  %v3118_v54 = vld [vmem:[#allocation4 + $0x188] ss:$16 sps:$4 sm:$0xff]   ;;  %v3122_v55 = vld [vmem:[#allocation4 + $0x1ac] ss:$16 sps:$4 sm:$0xff]   ;;  %v3121_v56 = vld [vmem:[#allocation4 + $0x1a0] ss:$16 sps:$4 sm:$0xff]  }
  0x49   :  { %999 = vmatprep.subr.bf16.mxu1 %v3071_v19  ;;  %1080 = vmatpush1.bf16.msra.mxu0 %v3070_v20  ;;  %v3125_v57 = vld [vmem:[#allocation4 + $0x1c4] ss:$16 sps:$4 sm:$0xff]   ;;  %v3124_v58 = vld [vmem:[#allocation4 + $0x1a8] ss:$16 sps:$4 sm:$0xff]   ;;  %v3128_v59 = vld [vmem:[#allocation4 + $0x1cc] ss:$16 sps:$4 sm:$0xff]  }
  0x4a   :  { %1081 = vmatprep.subr.bf16.mxu0 %v3074_v21  ;;  %1021 = vmatprep.mubr.bf16.mxu1 %v87_v48  ;;  %v3127_v60 = vld [vmem:[#allocation4 + $0x1c0] ss:$16 sps:$4 sm:$0xff]   ;;  %v3131_v61 = vld [vmem:[#allocation4 + $0x1e4] ss:$16 sps:$4 sm:$0xff]   ;;  %v3130_v62 = vld [vmem:[#allocation4 + $0x1c8] ss:$16 sps:$4 sm:$0xff]  }
  0x4b   :  { %1103 = vmatprep.mubr.bf16.mxu0 %v87_v48  ;;  %v3133_v63 = vld [vmem:[#allocation4 + $0x1e0] ss:$16 sps:$4 sm:$0xff]   ;;  %v3134_v0 = vld [vmem:[#allocation4 + $0x1ec] ss:$16 sps:$4 sm:$0xff]   ;;  %v3139_v2 = vld [vmem:[#allocation4 + $0x204] ss:$16 sps:$4 sm:$0xff]  }
  0x4c   :  { %1000 = vmatpush1.bf16.msra.mxu1 %v3073_v22  ;;  %v82_v1 = vld [vmem:[%s3862_s1] sm:$0xff]  ;;  %v3136_v3 = vld [vmem:[#allocation4 + $0x1e8] ss:$16 sps:$4 sm:$0xff]   ;;  %vm976_vm1 = vcmask 1041408   ;;  %vm2653_vm2 = vcmask 15360  }
  0x4d   :  { %1001 = vmatprep.subr.bf16.mxu1 %v3077_v23  ;;  %1082 = vmatpush1.bf16.msra.mxu0 %v3076_v24  ;;  %v86_v4 = vpack.c.bf16 %v82_v1, %v82_v1  ;;  %v3142_v5 = vld [vmem:[#allocation2 + $0x4] ss:$16 sps:$4 sm:$0xff]   ;;  %v3137_v6 = vld [vmem:[#allocation4 + $0x200] ss:$16 sps:$4 sm:$0xff]  }
  0x4e   :  { %1083 = vmatprep.subr.bf16.mxu0 %v3080_v25  ;;  %v3145_v7 = vld [vmem:[#allocation4 + $0x224] ss:$16 sps:$4 sm:$0xff]   ;;  %v3140_v8 = vld [vmem:[#allocation2] ss:$16 sps:$4 sm:$0xff]  }
  0x4f   :  { %v3148_v9 = vld [vmem:[#allocation2 + $0x24] ss:$16 sps:$4 sm:$0xff]   ;;  %v3143_v10 = vld [vmem:[#allocation4 + $0x220] ss:$16 sps:$4 sm:$0xff]  }
  0x50   :  { %1002 = vmatpush1.bf16.msra.mxu1 %v3079_v26  ;;  %v3151_v11 = vld [vmem:[#allocation4 + $0x244] ss:$16 sps:$4 sm:$0xff]   ;;  %v3146_v12 = vld [vmem:[#allocation2 + $0x20] ss:$16 sps:$4 sm:$0xff]  }
  0x51   :  { %1003 = vmatprep.subr.bf16.mxu1 %v3083_v27  ;;  %1084 = vmatpush1.bf16.msra.mxu0 %v3082_v28  ;;  %v3154_v13 = vld [vmem:[#allocation2 + $0x44] ss:$16 sps:$4 sm:$0xff]   ;;  %v3149_v14 = vld [vmem:[#allocation4 + $0x240] ss:$16 sps:$4 sm:$0xff]  }
  0x52   :  { %1085 = vmatprep.subr.bf16.mxu0 %v3086_v29  ;;  %v3157_v15 = vld [vmem:[#allocation4 + $0x264] ss:$16 sps:$4 sm:$0xff]   ;;  %v3152_v16 = vld [vmem:[#allocation2 + $0x40] ss:$16 sps:$4 sm:$0xff]   ;;  %v85_v29 = vld [vmem:[%s3862_s1 + $0x18] sm:$0xff] }
  0x53   :  { %v3160_v17 = vld [vmem:[#allocation2 + $0x64] ss:$16 sps:$4 sm:$0xff]   ;;  %v3155_v18 = vld [vmem:[#allocation4 + $0x260] ss:$16 sps:$4 sm:$0xff]  }
  0x54   :  { %1004 = vmatpush1.bf16.msra.mxu1 %v3085_v30  ;;  %v3163_v19 = vld [vmem:[#allocation4 + $0x284] ss:$16 sps:$4 sm:$0xff]   ;;  %v3158_v20 = vld [vmem:[#allocation2 + $0x60] ss:$16 sps:$4 sm:$0xff]  }
  0x55   :  { %1005 = vmatprep.subr.bf16.mxu1 %v3089_v31  ;;  %1086 = vmatpush1.bf16.msra.mxu0 %v3088_v32  ;;  %v3166_v21 = vld [vmem:[#allocation2 + $0x84] ss:$16 sps:$4 sm:$0xff]   ;;  %v3161_v22 = vld [vmem:[#allocation4 + $0x280] ss:$16 sps:$4 sm:$0xff]   ;;  %v3712_v31 = vpack.c.bf16 %v85_v29, %v85_v29  ;;  %v3258_v29 = vld [vmem:[#allocation4 + $0x28c] ss:$16 sps:$4 sm:$0xff]  }
  0x56   :  { %1087 = vmatprep.subr.bf16.mxu0 %v3092_v33  ;;  %v3169_v23 = vld [vmem:[#allocation4 + $0x2a4] ss:$16 sps:$4 sm:$0xff]   ;;  %v3164_v24 = vld [vmem:[#allocation2 + $0x80] ss:$16 sps:$4 sm:$0xff]   ;;  %v75_v33 = vld [vmem:[%s3861_s0 + $0x8] sm:$0xff] }
  0x57   :  { %v3172_v25 = vld [vmem:[#allocation2 + $0xa4] ss:$16 sps:$4 sm:$0xff]   ;;  %v3167_v26 = vld [vmem:[#allocation4 + $0x2a0] ss:$16 sps:$4 sm:$0xff]  }
  0x58   :  { %1006 = vmatpush1.bf16.msra.mxu1 %v3091_v34  ;;  %v3175_v27 = vld [vmem:[#allocation4 + $0x2c4] ss:$16 sps:$4 sm:$0xff]   ;;  %v3170_v28 = vld [vmem:[#allocation2 + $0xa0] ss:$16 sps:$4 sm:$0xff]  }
  0x59   :  { %1007 = vmatprep.subr.bf16.mxu1 %v3095_v35  ;;  %1088 = vmatpush1.bf16.msra.mxu0 %v3094_v36  ;;  %v3178_v30 = vld [vmem:[#allocation2 + $0xc4] ss:$16 sps:$4 sm:$0xff]   ;;  %v3173_v32 = vld [vmem:[#allocation4 + $0x2c0] ss:$16 sps:$4 sm:$0xff]   ;;  %v3719_v35 = vpack.c.bf16 %v75_v33, %v75_v33  ;;  %v3264_v33 = vld [vmem:[#allocation4 + $0x2ac] ss:$16 sps:$4 sm:$0xff]  }
  0x5a   :  { %1089 = vmatprep.subr.bf16.mxu0 %v3098_v37  ;;  %v3181_v34 = vld [vmem:[#allocation4 + $0x2e4] ss:$16 sps:$4 sm:$0xff]   ;;  %v3176_v36 = vld [vmem:[#allocation2 + $0xc0] ss:$16 sps:$4 sm:$0xff]  }
  0x5b   :  { %v3184_v37 = vld [vmem:[#allocation2 + $0xe4] ss:$16 sps:$4 sm:$0xff]   ;;  %v3191_v46 = vld [vmem:[#allocation4 + $0x320] ss:$16 sps:$4 sm:$0xff]  }
  0x5c   :  { %1008 = vmatpush1.bf16.msra.mxu1 %v3097_v38  ;;  %v3179_v38 = vld [vmem:[#allocation4 + $0x2e0] ss:$16 sps:$4 sm:$0xff]  }
  0x5d   :  { %1009 = vmatprep.subr.bf16.mxu1 %v3101_v39  ;;  %1090 = vmatpush1.bf16.msra.mxu0 %v3100_v40  ;;  %v3187_v39 = vld [vmem:[#allocation4 + $0x304] ss:$16 sps:$4 sm:$0xff]   ;;  %v3182_v40 = vld [vmem:[#allocation2 + $0xe0] ss:$16 sps:$4 sm:$0xff]  }
  0x5e   :  { %1091 = vmatprep.subr.bf16.mxu0 %v3104_v41  ;;  %v3190_v41 = vld [vmem:[#allocation2 + $0x104] ss:$16 sps:$4 sm:$0xff]   ;;  %v3194_v48 = vld [vmem:[#allocation2 + $0x120] ss:$16 sps:$4 sm:$0xff]  }
  0x5f   :  { %v340_v1 = vld [vmem:[#allocation4 + $0x3e0] sm:$0x33] }
  0x60   :  { %1010 = vmatpush1.bf16.msra.mxu1 %v3103_v42  ;;  %v3185_v42 = vld [vmem:[#allocation4 + $0x300] ss:$16 sps:$4 sm:$0xff]  }
  0x61   :  { %1011 = vmatprep.subr.bf16.mxu1 %v3107_v43  ;;  %1092 = vmatpush1.bf16.msra.mxu0 %v3106_v44  ;;  %v3193_v43 = vld [vmem:[#allocation4 + $0x324] ss:$16 sps:$4 sm:$0xff]   ;;  %v3188_v44 = vld [vmem:[#allocation2 + $0x100] ss:$16 sps:$4 sm:$0xff]  }
  0x62   :  { %1093 = vmatprep.subr.bf16.mxu0 %v3110_v45  ;;  %v3196_v45 = vld [vmem:[#allocation2 + $0x124] ss:$16 sps:$4 sm:$0xff]  }
  0x64   :  { %1012 = vmatpush1.bf16.msra.mxu1 %v3109_v47  ;;  %v3199_v47 = vld [vmem:[#allocation4 + $0x344] ss:$16 sps:$4 sm:$0xff]  }
  0x65   :  { %1013 = vmatprep.subr.bf16.mxu1 %v3113_v49  ;;  %1094 = vmatpush1.bf16.msra.mxu0 %v3112_v50  ;;  %v3202_v49 = vld [vmem:[#allocation2 + $0x144] ss:$16 sps:$4 sm:$0xff]   ;;  %v3197_v50 = vld [vmem:[#allocation4 + $0x340] ss:$16 sps:$4 sm:$0xff]  }
  0x66   :  { %1095 = vmatprep.subr.bf16.mxu0 %v3116_v51  ;;  %v3205_v51 = vld [vmem:[#allocation4 + $0x364] ss:$16 sps:$4 sm:$0xff]  }
  0x68   :  { %1014 = vmatpush1.bf16.msra.mxu1 %v3115_v52  ;;  %v3200_v52 = vld [vmem:[#allocation2 + $0x140] ss:$16 sps:$4 sm:$0xff]  }
  0x69   :  { %1015 = vmatprep.subr.bf16.mxu1 %v3119_v53  ;;  %1096 = vmatpush1.bf16.msra.mxu0 %v3118_v54  ;;  %v3208_v53 = vld [vmem:[#allocation2 + $0x164] ss:$16 sps:$4 sm:$0xff]   ;;  %v3203_v54 = vld [vmem:[#allocation4 + $0x360] ss:$16 sps:$4 sm:$0xff]  }
  0x6a   :  { %1097 = vmatprep.subr.bf16.mxu0 %v3122_v55  ;;  %v3211_v55 = vld [vmem:[#allocation4 + $0x384] ss:$16 sps:$4 sm:$0xff]  }
  0x6c   :  { %1016 = vmatpush1.bf16.msra.mxu1 %v3121_v56  ;;  %v3206_v56 = vld [vmem:[#allocation2 + $0x160] ss:$16 sps:$4 sm:$0xff]  }
  0x6d   :  { %1017 = vmatprep.subr.bf16.mxu1 %v3125_v57  ;;  %1098 = vmatpush1.bf16.msra.mxu0 %v3124_v58  ;;  %v3214_v57 = vld [vmem:[#allocation2 + $0x184] ss:$16 sps:$4 sm:$0xff]   ;;  %v3209_v58 = vld [vmem:[#allocation4 + $0x380] ss:$16 sps:$4 sm:$0xff]  }
  0x6e   :  { %1099 = vmatprep.subr.bf16.mxu0 %v3128_v59  ;;  %v3217_v59 = vld [vmem:[#allocation4 + $0x3a4] ss:$16 sps:$4 sm:$0xff]  }
  0x70   :  { %1018 = vmatpush1.bf16.msra.mxu1 %v3127_v60  ;;  %v3212_v60 = vld [vmem:[#allocation2 + $0x180] ss:$16 sps:$4 sm:$0xff]  }
  0x71   :  { %1019 = vmatprep.subr.bf16.mxu1 %v3131_v61  ;;  %1100 = vmatpush1.bf16.msra.mxu0 %v3130_v62  ;;  %v3220_v61 = vld [vmem:[#allocation2 + $0x1a4] ss:$16 sps:$4 sm:$0xff]   ;;  %v3215_v62 = vld [vmem:[#allocation4 + $0x3a0] ss:$16 sps:$4 sm:$0xff]  }
  0x72   :  { %1101 = vmatprep.subr.bf16.mxu0 %v3134_v0  ;;  %v3223_v0 = vld [vmem:[#allocation4 + $0x3c4] ss:$16 sps:$4 sm:$0xff]  }
  0x74   :  { %1020 = vmatpush1.bf16.msra.mxu1 %v3133_v63  ;;  %v3218_v63 = vld [vmem:[#allocation2 + $0x1a0] ss:$16 sps:$4 sm:$0xff]  }
  0x75   :  { %1030 = vmatprep.subr.bf16.mxu1 %v3139_v2  ;;  %1102 = vmatpush1.bf16.msra.mxu0 %v3136_v3  ;;  %v3226_v2 = vld [vmem:[#allocation2 + $0x1c4] ss:$16 sps:$4 sm:$0xff]   ;;  %v3221_v3 = vld [vmem:[#allocation4 + $0x3c0] ss:$16 sps:$4 sm:$0xff]  }
  0x76   :  { %1798 = vmatprep.subr.bf16.mxu0 %v3142_v5  ;;  %v2785_v5 = vcombine.low %v340_v1, %v340_v1 }
  0x77   :  { %1022 = vmatmul.mubr.bf16.vlgmr.msra.gmra.mrb[0].mxu1 %v86_v4 }
  0x78   :  { %1031 = vmatpush1.bf16.msra.mxu1 %v3137_v6  ;;  %1104 = vmatmul.mubr.bf16.vlgmr.msra.gmra.mrb[0].mxu0 %v86_v4  ;;  %v2786_v4 = vcombine.high %v340_v1, %v340_v1  ;;  %v3224_v6 = vld [vmem:[#allocation2 + $0x1c0] ss:$16 sps:$4 sm:$0xff]   ;;  %v3307_v1 = vld [vmem:[#allocation2 + $0x188] ss:$16 sps:$4 sm:$0xff]  }
  0x79   :  { %1032 = vmatprep.subr.bf16.mxu1 %v3145_v7  ;;  %1799 = vmatpush1.bf16.msra.mxu0 %v3140_v8  ;;  %v3231_v7 = vld [vmem:[#allocation2 + $0x1e4] ss:$16 sps:$4 sm:$0xff]  }
  0x7a   :  { %1800 = vmatprep.subr.bf16.mxu0 %v3148_v9  ;;  %2790 = vmatprep.mubr.msk.bf16.mxu1 %vm972_vm0, %v3712_v31  ;;  %v84_v8 = vld [vmem:[%s3862_s1 + $0x10] sm:$0xff]  ;;  %v978_v9 = vsel %vm976_vm1, %v2785_v5, 0  ;;  %v3313_v5 = vld [vmem:[#allocation2 + $0x1a8] ss:$16 sps:$4 sm:$0xff]  }
  0x7b   :  { %1830 = vmatprep.mubr.bf16.mxu0 %v3719_v35 }
  0x7c   :  { %1033 = vmatpush1.bf16.msra.mxu1 %v3143_v10  ;;  %v3229_v10 = vld [vmem:[#allocation2 + $0x1e0] ss:$16 sps:$4 sm:$0xff]  }
  0x7d   :  { %1034 = vmatprep.subr.bf16.mxu1 %v3151_v11  ;;  %1801 = vmatpush1.bf16.msra.mxu0 %v3146_v12  ;;  %v3234_v11 = vld [vmem:[#allocation4 + $0x20c] ss:$16 sps:$4 sm:$0xff]   ;;  %v74_v12 = vld [vmem:[%s3861_s0] sm:$0xff] }
  0x7e   :  { %1802 = vmatprep.subr.bf16.mxu0 %v3154_v13  ;;  %v3730_v13 = vpack.c.bf16 %v84_v8, %v84_v8  ;;  %v3321_v8 = vld [vmem:[#allocation2 + $0x1cc] ss:$16 sps:$4 sm:$0xff]  }
  0x80   :  { %1035 = vmatpush1.bf16.msra.mxu1 %v3149_v14  ;;  %v3237_v14 = vld [vmem:[#allocation2 + $0xc] ss:$16 sps:$4 sm:$0xff]  }
  0x81   :  { %1036 = vmatprep.subr.bf16.mxu1 %v3157_v15  ;;  %1803 = vmatpush1.bf16.msra.mxu0 %v3152_v16  ;;  %v3232_v15 = vld [vmem:[#allocation4 + $0x208] ss:$16 sps:$4 sm:$0xff]   ;;  %v3732_v16 = vpack.c.bf16 %v74_v12, %v74_v12 }
  0x82   :  { %1804 = vmatprep.subr.bf16.mxu0 %v3160_v17  ;;  %v3240_v17 = vld [vmem:[#allocation4 + $0x22c] ss:$16 sps:$4 sm:$0xff]  }
  0x84   :  { %1037 = vmatpush1.bf16.msra.mxu1 %v3155_v18  ;;  %v3235_v18 = vld [vmem:[#allocation2 + $0x8] ss:$16 sps:$4 sm:$0xff]  }
  0x85   :  { %1038 = vmatprep.subr.bf16.mxu1 %v3163_v19  ;;  %1805 = vmatpush1.bf16.msra.mxu0 %v3158_v20  ;;  %v3243_v19 = vld [vmem:[#allocation2 + $0x2c] ss:$16 sps:$4 sm:$0xff]   ;;  %v3238_v20 = vld [vmem:[#allocation4 + $0x228] ss:$16 sps:$4 sm:$0xff]  }
  0x86   :  { %1806 = vmatprep.subr.bf16.mxu0 %v3166_v21  ;;  %v3246_v21 = vld [vmem:[#allocation4 + $0x24c] ss:$16 sps:$4 sm:$0xff]  }
  0x88   :  { %1039 = vmatpush1.bf16.msra.mxu1 %v3161_v22  ;;  %v3241_v22 = vld [vmem:[#allocation2 + $0x28] ss:$16 sps:$4 sm:$0xff]  }
  0x89   :  { %1040 = vmatprep.subr.bf16.mxu1 %v3169_v23  ;;  %1807 = vmatpush1.bf16.msra.mxu0 %v3164_v24  ;;  %v3249_v23 = vld [vmem:[#allocation2 + $0x4c] ss:$16 sps:$4 sm:$0xff]   ;;  %v3244_v24 = vld [vmem:[#allocation4 + $0x248] ss:$16 sps:$4 sm:$0xff]  }
  0x8a   :  { %1808 = vmatprep.subr.bf16.mxu0 %v3172_v25  ;;  %v3252_v25 = vld [vmem:[#allocation4 + $0x26c] ss:$16 sps:$4 sm:$0xff]  }
  0x8c   :  { %1041 = vmatpush1.bf16.msra.mxu1 %v3167_v26  ;;  %v3247_v26 = vld [vmem:[#allocation2 + $0x48] ss:$16 sps:$4 sm:$0xff]  }
  0x8d   :  { %1042 = vmatprep.subr.bf16.mxu1 %v3175_v27  ;;  %1809 = vmatpush1.bf16.msra.mxu0 %v3170_v28  ;;  %v3255_v27 = vld [vmem:[#allocation2 + $0x6c] ss:$16 sps:$4 sm:$0xff]   ;;  %v3250_v28 = vld [vmem:[#allocation4 + $0x268] ss:$16 sps:$4 sm:$0xff]  }
  0x8e   :  { %1810 = vmatprep.subr.bf16.mxu0 %v3178_v30  ;;  %v3253_v30 = vld [vmem:[#allocation2 + $0x68] ss:$16 sps:$4 sm:$0xff]  }
  0x90   :  { %1043 = vmatpush1.bf16.msra.mxu1 %v3173_v32  ;;  %v3256_v32 = vld [vmem:[#allocation4 + $0x288] ss:$16 sps:$4 sm:$0xff]  }
  0x91   :  { %1044 = vmatprep.subr.bf16.mxu1 %v3181_v34  ;;  %1811 = vmatpush1.bf16.msra.mxu0 %v3176_v36  ;;  %v3259_v34 = vld [vmem:[#allocation2 + $0x88] ss:$16 sps:$4 sm:$0xff]  }
  0x92   :  { %1812 = vmatprep.subr.bf16.mxu0 %v3184_v37  ;;  %v3262_v36 = vld [vmem:[#allocation4 + $0x2a8] ss:$16 sps:$4 sm:$0xff]   ;;  %v3270_v37 = vld [vmem:[#allocation4 + $0x2cc] ss:$16 sps:$4 sm:$0xff]  }
  0x94   :  { %1045 = vmatpush1.bf16.msra.mxu1 %v3179_v38  ;;  %v3265_v38 = vld [vmem:[#allocation2 + $0xa8] ss:$16 sps:$4 sm:$0xff]  }
  0x95   :  { %1046 = vmatprep.subr.bf16.mxu1 %v3187_v39  ;;  %1813 = vmatpush1.bf16.msra.mxu0 %v3182_v40  ;;  %v3273_v39 = vld [vmem:[#allocation2 + $0xcc] ss:$16 sps:$4 sm:$0xff]   ;;  %v3268_v40 = vld [vmem:[#allocation4 + $0x2c8] ss:$16 sps:$4 sm:$0xff]  }
  0x96   :  { %1814 = vmatprep.subr.bf16.mxu0 %v3190_v41  ;;  %v3276_v41 = vld [vmem:[#allocation4 + $0x2ec] ss:$16 sps:$4 sm:$0xff]  }
  0x98   :  { %1047 = vmatpush1.bf16.msra.mxu1 %v3185_v42  ;;  %v3271_v42 = vld [vmem:[#allocation2 + $0xc8] ss:$16 sps:$4 sm:$0xff]  }
  0x99   :  { %1048 = vmatprep.subr.bf16.mxu1 %v3193_v43  ;;  %1815 = vmatpush1.bf16.msra.mxu0 %v3188_v44  ;;  %v3279_v43 = vld [vmem:[#allocation2 + $0xec] ss:$16 sps:$4 sm:$0xff]   ;;  %v3274_v44 = vld [vmem:[#allocation4 + $0x2e8] ss:$16 sps:$4 sm:$0xff]  }
  0x9a   :  { %1816 = vmatprep.subr.bf16.mxu0 %v3196_v45  ;;  %v3282_v45 = vld [vmem:[#allocation4 + $0x30c] ss:$16 sps:$4 sm:$0xff]  }
  0x9c   :  { %1049 = vmatpush1.bf16.msra.mxu1 %v3191_v46  ;;  %v3277_v46 = vld [vmem:[#allocation2 + $0xe8] ss:$16 sps:$4 sm:$0xff]  }
  0x9d   :  { %1050 = vmatprep.subr.bf16.mxu1 %v3199_v47  ;;  %1817 = vmatpush1.bf16.msra.mxu0 %v3194_v48  ;;  %v3285_v47 = vld [vmem:[#allocation2 + $0x10c] ss:$16 sps:$4 sm:$0xff]   ;;  %v3280_v48 = vld [vmem:[#allocation4 + $0x308] ss:$16 sps:$4 sm:$0xff]  }
  0x9e   :  { %1818 = vmatprep.subr.bf16.mxu0 %v3202_v49  ;;  %v3283_v49 = vld [vmem:[#allocation2 + $0x108] ss:$16 sps:$4 sm:$0xff]  }
  0xa0   :  { %1051 = vmatpush1.bf16.msra.mxu1 %v3197_v50  ;;  %v3288_v50 = vld [vmem:[#allocation4 + $0x32c] ss:$16 sps:$4 sm:$0xff]  }
  0xa1   :  { %1052 = vmatprep.subr.bf16.mxu1 %v3205_v51  ;;  %1819 = vmatpush1.bf16.msra.mxu0 %v3200_v52  ;;  %v3291_v51 = vld [vmem:[#allocation2 + $0x12c] ss:$16 sps:$4 sm:$0xff]   ;;  %v3286_v52 = vld [vmem:[#allocation4 + $0x328] ss:$16 sps:$4 sm:$0xff]  }
  0xa2   :  { %1820 = vmatprep.subr.bf16.mxu0 %v3208_v53  ;;  %v3289_v53 = vld [vmem:[#allocation2 + $0x128] ss:$16 sps:$4 sm:$0xff]  }
  0xa4   :  { %1053 = vmatpush1.bf16.msra.mxu1 %v3203_v54  ;;  %v3294_v54 = vld [vmem:[#allocation4 + $0x34c] ss:$16 sps:$4 sm:$0xff]  }
  0xa5   :  { %1054 = vmatprep.subr.bf16.mxu1 %v3211_v55  ;;  %1821 = vmatpush1.bf16.msra.mxu0 %v3206_v56  ;;  %v3297_v55 = vld [vmem:[#allocation2 + $0x14c] ss:$16 sps:$4 sm:$0xff]   ;;  %v3292_v56 = vld [vmem:[#allocation4 + $0x348] ss:$16 sps:$4 sm:$0xff]  }
  0xa6   :  { %1822 = vmatprep.subr.bf16.mxu0 %v3214_v57  ;;  %v3295_v57 = vld [vmem:[#allocation2 + $0x148] ss:$16 sps:$4 sm:$0xff]  }
  0xa8   :  { %1055 = vmatpush1.bf16.msra.mxu1 %v3209_v58  ;;  %v3300_v58 = vld [vmem:[#allocation4 + $0x36c] ss:$16 sps:$4 sm:$0xff]  }
  0xa9   :  { %1056 = vmatprep.subr.bf16.mxu1 %v3217_v59  ;;  %1823 = vmatpush1.bf16.msra.mxu0 %v3212_v60  ;;  %v3303_v59 = vld [vmem:[#allocation2 + $0x16c] ss:$16 sps:$4 sm:$0xff]   ;;  %v3298_v60 = vld [vmem:[#allocation4 + $0x368] ss:$16 sps:$4 sm:$0xff]  }
  0xaa   :  { %1824 = vmatprep.subr.bf16.mxu0 %v3220_v61  ;;  %v3301_v61 = vld [vmem:[#allocation2 + $0x168] ss:$16 sps:$4 sm:$0xff]  }
  0xac   :  { %1057 = vmatpush1.bf16.msra.mxu1 %v3215_v62  ;;  %v3306_v62 = vld [vmem:[#allocation4 + $0x38c] ss:$16 sps:$4 sm:$0xff]  }
  0xad   :  { %1058 = vmatprep.subr.bf16.mxu1 %v3223_v0  ;;  %1825 = vmatpush1.bf16.msra.mxu0 %v3218_v63  ;;  %v3309_v63 = vld [vmem:[#allocation2 + $0x18c] ss:$16 sps:$4 sm:$0xff]   ;;  %v3304_v0 = vld [vmem:[#allocation4 + $0x388] ss:$16 sps:$4 sm:$0xff]  }
  0xae   :  { %1826 = vmatprep.subr.bf16.mxu0 %v3226_v2  ;;  %v3312_v2 = vld [vmem:[#allocation4 + $0x3ac] ss:$16 sps:$4 sm:$0xff]  }
  0xb0   :  { %1059 = vmatpush1.bf16.msra.mxu1 %v3221_v3  ;;  %v3315_v3 = vld [vmem:[#allocation2 + $0x1ac] ss:$16 sps:$4 sm:$0xff]  }
  0xb1   :  { %2789 = vmatprep.subr.msk.bf16.mxu1 %vm976_vm1, %v2786_v4  ;;  %1827 = vmatpush1.bf16.msra.mxu0 %v3224_v6  ;;  %v3310_v4 = vld [vmem:[#allocation4 + $0x3a8] ss:$16 sps:$4 sm:$0xff]   ;;  %v3318_v6 = vld [vmem:[#allocation4 + $0x3cc] ss:$16 sps:$4 sm:$0xff]  }
  0xb2   :  { %1828 = vmatprep.subr.bf16.mxu0 %v3231_v7  ;;  %v341_v7 = vld [vmem:[#allocation4 + $0x3e8] sm:$0x33] }
  0xb3   :  { %v2787_v12 = vcombine.low %v341_v7, %v341_v7 }
  0xb4   :  { %1061 = vmatpush1.bf16.msra.mxu1 %v978_v9  ;;  %v3316_v9 = vld [vmem:[#allocation4 + $0x3c8] ss:$16 sps:$4 sm:$0xff]  }
  0xb5   :  { %1112 = vmatprep.subr.bf16.mxu1 %v3234_v11  ;;  %1829 = vmatpush1.bf16.msra.mxu0 %v3229_v10  ;;  %v3319_v10 = vld [vmem:[#allocation2 + $0x1c8] ss:$16 sps:$4 sm:$0xff]   ;;  %v2788_v11 = vcombine.high %v341_v7, %v341_v7 }
  0xb6   :  { %1880 = vmatprep.subr.bf16.mxu0 %v3237_v14  ;;  %v3326_v14 = vld [vmem:[#allocation2 + $0x1ec] ss:$16 sps:$4 sm:$0xff]  }
  0xb7   :  { %1063 = vmatmul.mubr.bf16.vlgmr.msra.gmra.mrb[4].mxu1 %v3730_v13 }
  0xb8   :  { %1113 = vmatpush1.bf16.msra.mxu1 %v3232_v15  ;;  %2792 = vmatprep.mubr.msk.bf16.mxu1 %vm972_vm0, %v3712_v31  ;;  %v3261_v31 = vld [vmem:[#allocation2 + $0x8c] ss:$16 sps:$4 sm:$0xff]   ;;  %v3329_v15 = vld [vmem:[#allocation2 + $0x204] ss:$16 sps:$4 sm:$0xff]  }
  0xb9   :  { %1831 = vmatmul.mubr.bf16.vlgmr.msra.gmra.mrb[4].mxu0 %v3732_v16  ;;  %1114 = vmatprep.subr.bf16.mxu1 %v3240_v17  ;;  %v3324_v17 = vld [vmem:[#allocation2 + $0x1e8] ss:$16 sps:$4 sm:$0xff]  }
  0xba   :  { %1881 = vmatpush1.bf16.msra.mxu0 %v3235_v18  ;;  %1912 = vmatprep.mubr.bf16.mxu0 %v3719_v35  ;;  %v3267_v35 = vld [vmem:[#allocation2 + $0xac] ss:$16 sps:$4 sm:$0xff]  }
  0xbb   :  { %1882 = vmatprep.subr.bf16.mxu0 %v3243_v19  ;;  %v77_v18 = vld [vmem:[%s3861_s0 + $0x18] sm:$0xff]  ;;  %v984_v19 = vsel %vm976_vm1, %v2787_v12, 0  ;;  %v3421_v12 = vld [vmem:[#allocation6] ss:$8 sps:$4 sm:$0xff]  }
  0xbc   :  { %1115 = vmatpush1.bf16.msra.mxu1 %v3238_v20  ;;  %v3327_v20 = vld [vmem:[#allocation2 + $0x200] ss:$16 sps:$4 sm:$0xff]  }
  0xbd   :  { %1116 = vmatprep.subr.bf16.mxu1 %v3246_v21  ;;  %v3332_v21 = vld [vmem:[#allocation2 + $0x224] ss:$16 sps:$4 sm:$0xff]  }
  0xbe   :  { %1883 = vmatpush1.bf16.msra.mxu0 %v3241_v22  ;;  %v3744_v22 = vpack.c.bf16 %v77_v18, %v77_v18  ;;  %v3395_v18 = vld [vmem:[#allocation2 + $0x2e8] ss:$16 sps:$4 sm:$0xff]  }
  0xbf   :  { %1884 = vmatprep.subr.bf16.mxu0 %v3249_v23  ;;  %v3330_v23 = vld [vmem:[#allocation2 + $0x220] ss:$16 sps:$4 sm:$0xff]  }
  0xc0   :  { %1117 = vmatpush1.bf16.msra.mxu1 %v3244_v24  ;;  %v3335_v24 = vld [vmem:[#allocation2 + $0x244] ss:$16 sps:$4 sm:$0xff]  }
  0xc1   :  { %1118 = vmatprep.subr.bf16.mxu1 %v3252_v25  ;;  %v3333_v25 = vld [vmem:[#allocation2 + $0x240] ss:$16 sps:$4 sm:$0xff]  }
  0xc2   :  { %1885 = vmatpush1.bf16.msra.mxu0 %v3247_v26  ;;  %v3338_v26 = vld [vmem:[#allocation2 + $0x264] ss:$16 sps:$4 sm:$0xff]  }
  0xc3   :  { %1886 = vmatprep.subr.bf16.mxu0 %v3255_v27  ;;  %v3336_v27 = vld [vmem:[#allocation2 + $0x260] ss:$16 sps:$4 sm:$0xff]  }
  0xc4   :  { %1119 = vmatpush1.bf16.msra.mxu1 %v3250_v28  ;;  %v3341_v28 = vld [vmem:[#allocation2 + $0x284] ss:$16 sps:$4 sm:$0xff]  }
  0xc5   :  { %1120 = vmatprep.subr.bf16.mxu1 %v3258_v29  ;;  %v3339_v29 = vld [vmem:[#allocation2 + $0x280] ss:$16 sps:$4 sm:$0xff]  }
  0xc6   :  { %1887 = vmatpush1.bf16.msra.mxu0 %v3253_v30  ;;  %v3342_v30 = vld [vmem:[#allocation2 + $0x2a0] ss:$16 sps:$4 sm:$0xff]  }
  0xc7   :  { %1888 = vmatprep.subr.bf16.mxu0 %v3261_v31  ;;  %v3347_v31 = vld [vmem:[#allocation2 + $0x2c4] ss:$16 sps:$4 sm:$0xff]  }
  0xc8   :  { %1121 = vmatpush1.bf16.msra.mxu1 %v3256_v32  ;;  %v3345_v32 = vld [vmem:[#allocation2 + $0x2c0] ss:$16 sps:$4 sm:$0xff]  }
  0xc9   :  { %1122 = vmatprep.subr.bf16.mxu1 %v3264_v33  ;;  %v3348_v33 = vld [vmem:[#allocation2 + $0x2e0] ss:$16 sps:$4 sm:$0xff]  }
  0xca   :  { %1889 = vmatpush1.bf16.msra.mxu0 %v3259_v34  ;;  %v3353_v34 = vld [vmem:[#allocation2 + $0x304] ss:$16 sps:$4 sm:$0xff]  }
  0xcb   :  { %1890 = vmatprep.subr.bf16.mxu0 %v3267_v35  ;;  %v3351_v35 = vld [vmem:[#allocation2 + $0x300] ss:$16 sps:$4 sm:$0xff]  }
  0xcc   :  { %1123 = vmatpush1.bf16.msra.mxu1 %v3262_v36  ;;  %v3356_v36 = vld [vmem:[#allocation2 + $0x324] ss:$16 sps:$4 sm:$0xff]  }
  0xcd   :  { %1124 = vmatprep.subr.bf16.mxu1 %v3270_v37  ;;  %v3354_v37 = vld [vmem:[#allocation2 + $0x320] ss:$16 sps:$4 sm:$0xff]  }
  0xce   :  { %1891 = vmatpush1.bf16.msra.mxu0 %v3265_v38  ;;  %v3359_v38 = vld [vmem:[#allocation2 + $0x344] ss:$16 sps:$4 sm:$0xff]  }
  0xcf   :  { %1892 = vmatprep.subr.bf16.mxu0 %v3273_v39  ;;  %v3357_v39 = vld [vmem:[#allocation2 + $0x340] ss:$16 sps:$4 sm:$0xff]  }
  0xd0   :  { %1125 = vmatpush1.bf16.msra.mxu1 %v3268_v40  ;;  %v3362_v40 = vld [vmem:[#allocation2 + $0x364] ss:$16 sps:$4 sm:$0xff]  }
  0xd1   :  { %1126 = vmatprep.subr.bf16.mxu1 %v3276_v41  ;;  %v3360_v41 = vld [vmem:[#allocation2 + $0x360] ss:$16 sps:$4 sm:$0xff]  }
  0xd2   :  { %1893 = vmatpush1.bf16.msra.mxu0 %v3271_v42  ;;  %v3365_v42 = vld [vmem:[#allocation2 + $0x384] ss:$16 sps:$4 sm:$0xff]  }
  0xd3   :  { %1894 = vmatprep.subr.bf16.mxu0 %v3279_v43  ;;  %v3363_v43 = vld [vmem:[#allocation2 + $0x380] ss:$16 sps:$4 sm:$0xff]  }
  0xd4   :  { %1127 = vmatpush1.bf16.msra.mxu1 %v3274_v44  ;;  %v3368_v44 = vld [vmem:[#allocation2 + $0x3a4] ss:$16 sps:$4 sm:$0xff]  }
  0xd5   :  { %1128 = vmatprep.subr.bf16.mxu1 %v3282_v45  ;;  %v3366_v45 = vld [vmem:[#allocation2 + $0x3a0] ss:$16 sps:$4 sm:$0xff]  }
  0xd6   :  { %1895 = vmatpush1.bf16.msra.mxu0 %v3277_v46  ;;  %v3371_v46 = vld [vmem:[#allocation2 + $0x3c4] ss:$16 sps:$4 sm:$0xff]  }
  0xd7   :  { %1896 = vmatprep.subr.bf16.mxu0 %v3285_v47  ;;  %v214_v47 = vld [vmem:[#allocation2 + $0x3e0] sm:$0x33] }
  0xd8   :  { %1129 = vmatpush1.bf16.msra.mxu1 %v3280_v48  ;;  %v3369_v48 = vld [vmem:[#allocation2 + $0x3c0] ss:$16 sps:$4 sm:$0xff]  }
  0xd9   :  { %1130 = vmatprep.subr.bf16.mxu1 %v3288_v50  ;;  %v2917_v50 = vcombine.low %v214_v47, %v214_v47 }
  0xda   :  { %1897 = vmatpush1.bf16.msra.mxu0 %v3283_v49  ;;  %v2918_v49 = vcombine.high %v214_v47, %v214_v47 }
  0xdb   :  { %1898 = vmatprep.subr.bf16.mxu0 %v3291_v51  ;;  %v76_v51 = vld [vmem:[%s3861_s0 + $0x10] sm:$0xff] }
  0xdc   :  { %1131 = vmatpush1.bf16.msra.mxu1 %v3286_v52  ;;  %v1787_v52 = vsel %vm976_vm1, %v2917_v50, 0 }
  0xdd   :  { %1132 = vmatprep.subr.bf16.mxu1 %v3294_v54  ;;  %v3755_v54 = vpack.c.bf16 %v76_v51, %v76_v51  ;;  %v3448_v51 = vld [vmem:[#allocation6 + $0x90] ss:$8 sps:$4 sm:$0xff]  }
  0xde   :  { %1899 = vmatpush1.bf16.msra.mxu0 %v3289_v53  ;;  %v3376_v53 = vld [vmem:[#allocation2 + $0x20c] ss:$16 sps:$4 sm:$0xff]  }
  0xdf   :  { %1900 = vmatprep.subr.bf16.mxu0 %v3297_v55  ;;  %v3374_v55 = vld [vmem:[#allocation2 + $0x208] ss:$16 sps:$4 sm:$0xff]  }
  0xe0   :  { %1133 = vmatpush1.bf16.msra.mxu1 %v3292_v56  ;;  %v3379_v56 = vld [vmem:[#allocation2 + $0x22c] ss:$16 sps:$4 sm:$0xff]  }
  0xe1   :  { %1134 = vmatprep.subr.bf16.mxu1 %v3300_v58  ;;  %v3382_v58 = vld [vmem:[#allocation2 + $0x24c] ss:$16 sps:$4 sm:$0xff]  }
  0xe2   :  { %1901 = vmatpush1.bf16.msra.mxu0 %v3295_v57  ;;  %v3377_v57 = vld [vmem:[#allocation2 + $0x228] ss:$16 sps:$4 sm:$0xff]  }
  0xe3   :  { %1902 = vmatprep.subr.bf16.mxu0 %v3303_v59  ;;  %v3380_v59 = vld [vmem:[#allocation2 + $0x248] ss:$16 sps:$4 sm:$0xff]  }
  0xe4   :  { %1135 = vmatpush1.bf16.msra.mxu1 %v3298_v60  ;;  %v3385_v60 = vld [vmem:[#allocation2 + $0x26c] ss:$16 sps:$4 sm:$0xff]  }
  0xe5   :  { %1136 = vmatprep.subr.bf16.mxu1 %v3306_v62  ;;  %v3388_v62 = vld [vmem:[#allocation2 + $0x28c] ss:$16 sps:$4 sm:$0xff]  }
  0xe6   :  { %1903 = vmatpush1.bf16.msra.mxu0 %v3301_v61  ;;  %v3383_v61 = vld [vmem:[#allocation2 + $0x268] ss:$16 sps:$4 sm:$0xff]  }
  0xe7   :  { %1904 = vmatprep.subr.bf16.mxu0 %v3309_v63  ;;  %v3386_v63 = vld [vmem:[#allocation2 + $0x288] ss:$16 sps:$4 sm:$0xff]  }
  0xe8   :  { %1137 = vmatpush1.bf16.msra.mxu1 %v3304_v0  ;;  %v3391_v0 = vld [vmem:[#allocation2 + $0x2ac] ss:$16 sps:$4 sm:$0xff]  }
  0xe9   :  { %1138 = vmatprep.subr.bf16.mxu1 %v3312_v2  ;;  %v3394_v2 = vld [vmem:[#allocation2 + $0x2cc] ss:$16 sps:$4 sm:$0xff]  }
  0xea   :  { %1905 = vmatpush1.bf16.msra.mxu0 %v3307_v1  ;;  %v3389_v1 = vld [vmem:[#allocation2 + $0x2a8] ss:$16 sps:$4 sm:$0xff]  }
  0xeb   :  { %1906 = vmatprep.subr.bf16.mxu0 %v3315_v3 }
  0xec   :  { %1139 = vmatpush1.bf16.msra.mxu1 %v3310_v4 }
  0xed   :  { %1140 = vmatprep.subr.bf16.mxu1 %v3318_v6  ;;  %v3392_v6 = vld [vmem:[#allocation2 + $0x2c8] ss:$16 sps:$4 sm:$0xff]  }
  0xee   :  { %1907 = vmatpush1.bf16.msra.mxu0 %v3313_v5 }
  0xef   :  { %1908 = vmatprep.subr.bf16.mxu0 %v3321_v8 }
  0xf0   :  { %1141 = vmatpush1.bf16.msra.mxu1 %v3316_v9  ;;  %v3397_v9 = vld [vmem:[#allocation2 + $0x2ec] ss:$16 sps:$4 sm:$0xff]  }
  0xf1   :  { %2791 = vmatprep.subr.msk.bf16.mxu1 %vm976_vm1, %v2788_v11 }
  0xf2   :  { %1909 = vmatpush1.bf16.msra.mxu0 %v3319_v10 }
  0xf3   :  { %1910 = vmatprep.subr.bf16.mxu0 %v3326_v14  ;;  %v3423_v14 = vld [vmem:[#allocation6 + $0x4] ss:$8 sps:$4 sm:$0xff]  }
  0xf4   :  { %1143 = vmatpush1.bf16.msra.mxu1 %v984_v19  ;;  %v3400_v19 = vld [vmem:[#allocation2 + $0x30c] ss:$16 sps:$4 sm:$0xff]  }
  0xf5   :  { %1839 = vmatprep.subr.bf16.mxu1 %v3329_v15 }
  0xf6   :  { %1911 = vmatpush1.bf16.msra.mxu0 %v3324_v17  ;;  %v3426_v17 = vld [vmem:[#allocation6 + $0x14] ss:$8 sps:$4 sm:$0xff]  }
  0xf7   :  { %1145 = vmatmul.mubr.bf16.vlgmr.msra.gmra.mrb[8].mxu1 %v3730_v13  ;;  %v3344_v13 = vld [vmem:[#allocation2 + $0x2a4] ss:$16 sps:$4 sm:$0xff]   ;;  %2392 = vmatprep.subr.bf16.mxu0 %v3423_v14 }
  0xf8   :  { %1840 = vmatpush1.bf16.msra.mxu1 %v3327_v20  ;;  %2922 = vmatprep.mubr.msk.bf16.mxu1 %vm972_vm0, %v3744_v22  ;;  %v3424_v20 = vld [vmem:[#allocation6 + $0x10] ss:$8 sps:$4 sm:$0xff]  }
  0xf9   :  { %1913 = vmatmul.mubr.bf16.vlgmr.msra.gmra.mrb[8].mxu0 %v3732_v16  ;;  %1841 = vmatprep.subr.bf16.mxu1 %v3332_v21  ;;  %v3350_v16 = vld [vmem:[#allocation2 + $0x2e4] ss:$16 sps:$4 sm:$0xff]  }
  0xfa   :  { %2393 = vmatpush1.bf16.msra.mxu0 %v3421_v12  ;;  %v3429_v21 = vld [vmem:[#allocation6 + $0x24] ss:$8 sps:$4 sm:$0xff]  }
  0xfb   :  { %2394 = vmatprep.subr.bf16.mxu0 %v3426_v17  ;;  %v3466_v17 = vld [vmem:[#allocation6 + $0xf0] ss:$8 sps:$4 sm:$0xff]  }
  0xfc   :  { %1842 = vmatpush1.bf16.msra.mxu1 %v3330_v23  ;;  %v3403_v23 = vld [vmem:[#allocation2 + $0x32c] ss:$16 sps:$4 sm:$0xff]  }
  0xfd   :  { %1843 = vmatprep.subr.bf16.mxu1 %v3335_v24  ;;  %v3427_v24 = vld [vmem:[#allocation6 + $0x20] ss:$8 sps:$4 sm:$0xff]  }
  0xfe   :  { %2395 = vmatpush1.bf16.msra.mxu0 %v3424_v20 }
  0xff   :  { %2396 = vmatprep.subr.bf16.mxu0 %v3429_v21 }
 0x100   :  { %1844 = vmatpush1.bf16.msra.mxu1 %v3333_v25  ;;  %v3432_v25 = vld [vmem:[#allocation6 + $0x34] ss:$8 sps:$4 sm:$0xff]  }
 0x101   :  { %1845 = vmatprep.subr.bf16.mxu1 %v3338_v26  ;;  %v3401_v26 = vld [vmem:[#allocation2 + $0x328] ss:$16 sps:$4 sm:$0xff]  }
 0x102   :  { %2397 = vmatpush1.bf16.msra.mxu0 %v3427_v24 }
 0x103   :  { %2398 = vmatprep.subr.bf16.mxu0 %v3432_v25 }
 0x104   :  { %1846 = vmatpush1.bf16.msra.mxu1 %v3336_v27  ;;  %v3406_v27 = vld [vmem:[#allocation2 + $0x34c] ss:$16 sps:$4 sm:$0xff]  }
 0x105   :  { %1847 = vmatprep.subr.bf16.mxu1 %v3341_v28  ;;  %v3430_v28 = vld [vmem:[#allocation6 + $0x30] ss:$8 sps:$4 sm:$0xff]  }
 0x106   :  { %2399 = vmatpush1.bf16.msra.mxu0 %v3430_v28 }
 0x108   :  { %1848 = vmatpush1.bf16.msra.mxu1 %v3339_v29  ;;  %v3435_v29 = vld [vmem:[#allocation6 + $0x44] ss:$8 sps:$4 sm:$0xff]  }
 0x109   :  { %1849 = vmatprep.subr.bf16.mxu1 %v3344_v13  ;;  %v3404_v13 = vld [vmem:[#allocation2 + $0x348] ss:$16 sps:$4 sm:$0xff]   ;;  %2400 = vmatprep.subr.bf16.mxu0 %v3435_v29  ;;  %v3517_v29 = vld [vmem:[%s3868_s7 + $0x40] sm:$0xff]  }
 0x10c   :  { %1850 = vmatpush1.bf16.msra.mxu1 %v3342_v30  ;;  %v3409_v30 = vld [vmem:[#allocation2 + $0x36c] ss:$16 sps:$4 sm:$0xff]  }
 0x10d   :  { %1851 = vmatprep.subr.bf16.mxu1 %v3347_v31  ;;  %v3433_v31 = vld [vmem:[#allocation6 + $0x40] ss:$8 sps:$4 sm:$0xff]  }
 0x10e   :  { %2401 = vmatpush1.bf16.msra.mxu0 %v3433_v31  ;;  %v3522_v31 = vld [vmem:[%s3868_s7 + $0x10] sm:$0xff]  }
 0x110   :  { %1852 = vmatpush1.bf16.msra.mxu1 %v3345_v32  ;;  %v3438_v32 = vld [vmem:[#allocation6 + $0x54] ss:$8 sps:$4 sm:$0xff]  }
 0x111   :  { %1853 = vmatprep.subr.bf16.mxu1 %v3350_v16  ;;  %v3407_v16 = vld [vmem:[#allocation2 + $0x368] ss:$16 sps:$4 sm:$0xff]   ;;  %2402 = vmatprep.subr.bf16.mxu0 %v3438_v32 }
 0x112   :  { %v3523_v32 = vld [vmem:[%s3868_s7 + $0x58] sm:$0xff]  }
 0x114   :  { %1854 = vmatpush1.bf16.msra.mxu1 %v3348_v33  ;;  %v3412_v33 = vld [vmem:[#allocation2 + $0x38c] ss:$16 sps:$4 sm:$0xff]  }
 0x115   :  { %1855 = vmatprep.subr.bf16.mxu1 %v3353_v34  ;;  %v3436_v34 = vld [vmem:[#allocation6 + $0x50] ss:$8 sps:$4 sm:$0xff]  }
 0x116   :  { %2403 = vmatpush1.bf16.msra.mxu0 %v3436_v34  ;;  %v3526_v34 = vld [vmem:[%s3868_s7 + $0x20] sm:$0xff]  }
 0x118   :  { %1856 = vmatpush1.bf16.msra.mxu1 %v3351_v35  ;;  %v3441_v35 = vld [vmem:[#allocation6 + $0x64] ss:$8 sps:$4 sm:$0xff]  }
 0x119   :  { %1857 = vmatprep.subr.bf16.mxu1 %v3356_v36  ;;  %v3410_v36 = vld [vmem:[#allocation2 + $0x388] ss:$16 sps:$4 sm:$0xff]   ;;  %2404 = vmatprep.subr.bf16.mxu0 %v3441_v35 }
 0x11a   :  { %v3527_v35 = vld [vmem:[%s3868_s7 + $0x68] sm:$0xff]  }
 0x11c   :  { %1858 = vmatpush1.bf16.msra.mxu1 %v3354_v37  ;;  %v3415_v37 = vld [vmem:[#allocation2 + $0x3ac] ss:$16 sps:$4 sm:$0xff]  }
 0x11d   :  { %1859 = vmatprep.subr.bf16.mxu1 %v3359_v38  ;;  %v3439_v38 = vld [vmem:[#allocation6 + $0x60] ss:$8 sps:$4 sm:$0xff]  }
 0x11e   :  { %2405 = vmatpush1.bf16.msra.mxu0 %v3439_v38 }
 0x120   :  { %1860 = vmatpush1.bf16.msra.mxu1 %v3357_v39  ;;  %v3444_v39 = vld [vmem:[#allocation6 + $0x74] ss:$8 sps:$4 sm:$0xff]  }
 0x121   :  { %1861 = vmatprep.subr.bf16.mxu1 %v3362_v40  ;;  %v3413_v40 = vld [vmem:[#allocation2 + $0x3a8] ss:$16 sps:$4 sm:$0xff]   ;;  %2406 = vmatprep.subr.bf16.mxu0 %v3444_v39 }
 0x124   :  { %1862 = vmatpush1.bf16.msra.mxu1 %v3360_v41  ;;  %v3418_v41 = vld [vmem:[#allocation2 + $0x3cc] ss:$16 sps:$4 sm:$0xff]  }
 0x125   :  { %1863 = vmatprep.subr.bf16.mxu1 %v3365_v42  ;;  %v3442_v42 = vld [vmem:[#allocation6 + $0x70] ss:$8 sps:$4 sm:$0xff]  }
 0x126   :  { %2407 = vmatpush1.bf16.msra.mxu0 %v3442_v42 }
 0x128   :  { %1864 = vmatpush1.bf16.msra.mxu1 %v3363_v43  ;;  %v215_v43 = vld [vmem:[#allocation2 + $0x3e8] sm:$0x33] }
 0x129   :  { %1865 = vmatprep.subr.bf16.mxu1 %v3368_v44  ;;  %v3447_v44 = vld [vmem:[#allocation6 + $0x84] ss:$8 sps:$4 sm:$0xff]   ;;  %v2919_v47 = vcombine.low %v215_v43, %v215_v43 }
 0x12a   :  { %2408 = vmatprep.subr.bf16.mxu0 %v3447_v44 }
 0x12b   :  { %v1793_v50 = vsel %vm976_vm1, %v2919_v47, 0 }
 0x12c   :  { %1866 = vmatpush1.bf16.msra.mxu1 %v3366_v45  ;;  %v3416_v45 = vld [vmem:[#allocation2 + $0x3c8] ss:$16 sps:$4 sm:$0xff]  }
 0x12d   :  { %1867 = vmatprep.subr.bf16.mxu1 %v3371_v46  ;;  %v2920_v46 = vcombine.high %v215_v43, %v215_v43 }
 0x130   :  { %1868 = vmatpush1.bf16.msra.mxu1 %v3369_v48  ;;  %v3445_v48 = vld [vmem:[#allocation6 + $0x80] ss:$8 sps:$4 sm:$0xff]  }
 0x131   :  { %2921 = vmatprep.subr.msk.bf16.mxu1 %vm976_vm1, %v2918_v49  ;;  %v3450_v49 = vld [vmem:[#allocation6 + $0x94] ss:$8 sps:$4 sm:$0xff]   ;;  %2409 = vmatpush1.bf16.msra.mxu0 %v3445_v48 }
 0x132   :  { %2410 = vmatprep.subr.bf16.mxu0 %v3450_v49 }
 0x134   :  { %1870 = vmatpush1.bf16.msra.mxu1 %v1787_v52  ;;  %v3453_v52 = vld [vmem:[#allocation6 + $0xa4] ss:$8 sps:$4 sm:$0xff]  }
 0x135   :  { %1921 = vmatprep.subr.bf16.mxu1 %v3376_v53  ;;  %2411 = vmatpush1.bf16.msra.mxu0 %v3448_v51  ;;  %v3451_v53 = vld [vmem:[#allocation6 + $0xa0] ss:$8 sps:$4 sm:$0xff]  }
 0x136   :  { %2412 = vmatprep.subr.bf16.mxu0 %v3453_v52 }
 0x137   :  { %1872 = vmatmul.mubr.bf16.vlgmr.msra.gmra.mrb[12].mxu1 %v3755_v54 }
 0x138   :  { %1922 = vmatpush1.bf16.msra.mxu1 %v3374_v55  ;;  %2924 = vmatprep.mubr.msk.bf16.mxu1 %vm972_vm0, %v3744_v22  ;;  %v3398_v22 = vld [vmem:[#allocation2 + $0x308] ss:$16 sps:$4 sm:$0xff]   ;;  %v3456_v55 = vld [vmem:[#allocation6 + $0xb4] ss:$8 sps:$4 sm:$0xff]  }
 0x139   :  { %1923 = vmatprep.subr.bf16.mxu1 %v3379_v56  ;;  %2413 = vmatpush1.bf16.msra.mxu0 %v3451_v53  ;;  %v3454_v56 = vld [vmem:[#allocation6 + $0xb0] ss:$8 sps:$4 sm:$0xff]  }
 0x13a   :  { %2414 = vmatprep.subr.bf16.mxu0 %v3456_v55 }
 0x13c   :  { %1924 = vmatpush1.bf16.msra.mxu1 %v3377_v57  ;;  %v3459_v57 = vld [vmem:[#allocation6 + $0xc4] ss:$8 sps:$4 sm:$0xff]  }
 0x13d   :  { %1925 = vmatprep.subr.bf16.mxu1 %v3382_v58  ;;  %2415 = vmatpush1.bf16.msra.mxu0 %v3454_v56  ;;  %v3457_v58 = vld [vmem:[#allocation6 + $0xc0] ss:$8 sps:$4 sm:$0xff]  }
 0x13e   :  { %2416 = vmatprep.subr.bf16.mxu0 %v3459_v57  ;;  %v3469_v56 = vld [vmem:[#allocation6 + $0x100] ss:$8 sps:$4 sm:$0xff]  }
 0x140   :  { %1926 = vmatpush1.bf16.msra.mxu1 %v3380_v59  ;;  %v3462_v59 = vld [vmem:[#allocation6 + $0xd4] ss:$8 sps:$4 sm:$0xff]  }
 0x141   :  { %1927 = vmatprep.subr.bf16.mxu1 %v3385_v60  ;;  %2417 = vmatpush1.bf16.msra.mxu0 %v3457_v58  ;;  %v3460_v60 = vld [vmem:[#allocation6 + $0xd0] ss:$8 sps:$4 sm:$0xff]   ;;  %v3474_v58 = vld [vmem:[#allocation6 + $0x114] ss:$8 sps:$4 sm:$0xff]  }
 0x142   :  { %2418 = vmatprep.subr.bf16.mxu0 %v3462_v59  ;;  %v3472_v59 = vld [vmem:[#allocation6 + $0x110] ss:$8 sps:$4 sm:$0xff]  }
 0x144   :  { %1928 = vmatpush1.bf16.msra.mxu1 %v3383_v61 }
 0x145   :  { %1929 = vmatprep.subr.bf16.mxu1 %v3388_v62  ;;  %2419 = vmatpush1.bf16.msra.mxu0 %v3460_v60  ;;  %v3477_v60 = vld [vmem:[#allocation6 + $0x124] ss:$8 sps:$4 sm:$0xff]  }
 0x148   :  { %1930 = vmatpush1.bf16.msra.mxu1 %v3386_v63 }
 0x149   :  { %1931 = vmatprep.subr.bf16.mxu1 %v3391_v0  ;;  %v3465_v0 = vld [vmem:[#allocation6 + $0xe4] ss:$8 sps:$4 sm:$0xff]  }
 0x14a   :  { %v3760_v3 = vpop.f32.mrb[0].mxu1  ;;  %2420 = vmatprep.subr.bf16.mxu0 %v3465_v0  ;;  %v3483_v0 = vld [vmem:[#allocation6 + $0x144] ss:$8 sps:$4 sm:$0xff]  }
 0x14b   :  { %v3762_v4 = vpop.f32.mrb[1].mxu1  ;;  %v3764_v7 = vpop.f32.mrb[0].mxu0 }
 0x14c   :  { %v1027_v5 = vpop.f32.mrb[2].mxu1  ;;  %1932 = vmatpush1.bf16.msra.mxu1 %v3389_v1  ;;  %v3766_v10 = vpop.f32.mrb[1].mxu0 }
 0x14d   :  { %v1028_v8 = vpop.f32.mrb[3].mxu1  ;;  %1933 = vmatprep.subr.bf16.mxu1 %v3394_v2  ;;  %v1109_v11 = vpop.f32.mrb[2].mxu0  ;;  %v3463_v5 = vld [vmem:[#allocation6 + $0xe0] ss:$8 sps:$4 sm:$0xff]  }
 0x14e   :  { %v1110_v15 = vpop.f32.mrb[3].mxu0  ;;  %2421 = vmatpush1.bf16.msra.mxu0 %v3463_v5  ;;  %v3489_v5 = vld [vmem:[#allocation6 + $0x164] ss:$8 sps:$4 sm:$0xff]  }
 0x14f   :  { %v3468_v15 = vld [vmem:[#allocation6 + $0xf4] ss:$8 sps:$4 sm:$0xff]  }
 0x150   :  { %1934 = vmatpush1.bf16.msra.mxu1 %v3392_v6  ;;  %2422 = vmatprep.subr.bf16.mxu0 %v3468_v15  ;;  %v3496_v15 = vld [vmem:[#allocation6 + $0x190] ss:$8 sps:$4 sm:$0xff]  }
 0x151   :  { %1935 = vmatprep.subr.bf16.mxu1 %v3397_v9 }
 0x152   :  { %2423 = vmatpush1.bf16.msra.mxu0 %v3466_v17  ;;  %v3501_v17 = vld [vmem:[#allocation6 + $0x1a4] ss:$8 sps:$4 sm:$0xff]  }
 0x154   :  { %1936 = vmatpush1.bf16.msra.mxu1 %v3395_v18 }
 0x155   :  { %1937 = vmatprep.subr.bf16.mxu1 %v3400_v19 }
 0x158   :  { %1938 = vmatpush1.bf16.msra.mxu1 %v3398_v22 }
 0x159   :  { %1939 = vmatprep.subr.bf16.mxu1 %v3403_v23 }
 0x15c   :  { %1940 = vmatpush1.bf16.msra.mxu1 %v3401_v26 }
 0x15d   :  { %1941 = vmatprep.subr.bf16.mxu1 %v3406_v27 }
 0x160   :  { %1942 = vmatpush1.bf16.msra.mxu1 %v3404_v13  ;;  %v3520_v13 = vld [vmem:[%s3868_s7 + $0x8] sm:$0xff]  }
 0x161   :  { %1943 = vmatprep.subr.bf16.mxu1 %v3409_v30  ;;  %v3521_v30 = vld [vmem:[%s3868_s7 + $0x50] sm:$0xff]  }
 0x164   :  { %1944 = vmatpush1.bf16.msra.mxu1 %v3407_v16  ;;  %v3524_v16 = vld [vmem:[%s3868_s7 + $0x18] sm:$0xff]  }
 0x165   :  { %1945 = vmatprep.subr.bf16.mxu1 %v3412_v33  ;;  %v3525_v33 = vld [vmem:[%s3868_s7 + $0x60] sm:$0xff]  }
 0x168   :  { %1946 = vmatpush1.bf16.msra.mxu1 %v3410_v36  ;;  %v3528_v36 = vld [vmem:[%s3868_s7 + $0x28] sm:$0xff]  }
 0x169   :  { %1947 = vmatprep.subr.bf16.mxu1 %v3415_v37  ;;  %v1964_v37 = vlaneseq }
 0x16b   :  { %v3815_v38 = vshrl.u32 %v1964_v37, 7 }
 0x16c   :  { %1948 = vmatpush1.bf16.msra.mxu1 %v3413_v40  ;;  %v3821_v40 = vld [vmem:[%s3865_s4] sm:$0xf] }
 0x16d   :  { %1949 = vmatprep.subr.bf16.mxu1 %v3418_v41  ;;  %v1966_v39 = vsub.s32 0, %v3815_v38  ;;  %v1970_v41 = vsub.s32 1, %v3815_v38 }
 0x16f   :  { %v1967_v42 = vrot.slane %v3821_v40, %v1966_v39  ;;  %v1971_v44 = vrot.slane %v3821_v40, %v1970_v41 }
 0x170   :  { %1950 = vmatpush1.bf16.msra.mxu1 %v3416_v45 }
 0x171   :  { %2923 = vmatprep.subr.msk.bf16.mxu1 %vm976_vm1, %v2920_v46 }
 0x174   :  { %1952 = vmatpush1.bf16.msra.mxu1 %v1793_v50 }
 0x175   :  { %3006 = vmatprep.subr.bf16.mxu1 %v3517_v29 }
 0x177   :  { %1954 = vmatmul.mubr.bf16.vlgmr.msra.gmra.mrb[16].mxu1 %v3755_v54 }
 0x18a   :  { %v1064_v61 = vpop.f32.mrb[4].mxu1 }
 0x18b   :  { %v1065_v62 = vadd.f32 %v1064_v61, %v3760_v3  ;;  %v1066_v63 = vpop.f32.mrb[5].mxu1  ;;  %v3471_v3 = vld [vmem:[#allocation6 + $0x104] ss:$8 sps:$4 sm:$0xff]   ;;  %v3475_v61 = vld [vmem:[#allocation6 + $0x120] ss:$8 sps:$4 sm:$0xff]  }
 0x18c   :  { %v1067_v1 = vadd.f32 %v1066_v63, %v3762_v4  ;;  %v1068_v54 = vpop.f32.mrb[6].mxu1  ;;  %v1832_v2 = vpop.f32.mrb[4].mxu0  ;;  %2433 = vmatprep.subr.bf16.mxu0 %v3471_v3  ;;  %v3478_v63 = vld [vmem:[#allocation6 + $0x130] ss:$8 sps:$4 sm:$0xff]   ;;  %v3499_v3 = vld [vmem:[#allocation6 + $0x1a0] ss:$8 sps:$4 sm:$0xff]  }
 0x18d   :  { %v1833_v6 = vadd.f32 %v1832_v2, %v1065_v62  ;;  %v1069_v8 = vpop.f32.mrb[7].mxu1  ;;  %v1834_v9 = vpop.f32.mrb[5].mxu0  ;;  %v3480_v62 = vld [vmem:[#allocation6 + $0x134] ss:$8 sps:$4 sm:$0xff]   ;;  %v3484_v2 = vld [vmem:[#allocation6 + $0x150] ss:$8 sps:$4 sm:$0xff]  }
 0x18e   :  { %v1835_v11 = vadd.f32 %v1834_v9, %v1067_v1  ;;  %v1836_v12 = vpop.f32.mrb[6].mxu0  ;;  %v3481_v1 = vld [vmem:[#allocation6 + $0x140] ss:$8 sps:$4 sm:$0xff]   ;;  %v3486_v54 = vld [vmem:[#allocation6 + $0x154] ss:$8 sps:$4 sm:$0xff]  }
 0x18f   :  { %v1837_v14 = vpop.f32.mrb[7].mxu0  ;;  %v3492_v8 = vld [vmem:[#allocation6 + $0x174] ss:$8 sps:$4 sm:$0xff]   ;;  %v3490_v9 = vld [vmem:[#allocation6 + $0x170] ss:$8 sps:$4 sm:$0xff]  }
 0x190   :  { %v3493_v12 = vld [vmem:[#allocation6 + $0x180] ss:$8 sps:$4 sm:$0xff]   ;;  %v3498_v14 = vld [vmem:[#allocation6 + $0x194] ss:$8 sps:$4 sm:$0xff]  }
 0x1ca   :  { %v1146_v18 = vpop.f32.mrb[8].mxu1 }
 0x1cb   :  { %v1147_v4 = vadd.f32 %v1146_v18, %v3764_v7  ;;  %v1148_v19 = vpop.f32.mrb[9].mxu1  ;;  %v3518_v7 = vld [vmem:[%s3868_s7] sm:$0xff]   ;;  %v3504_v18 = vld [vmem:[#allocation6 + $0x1b4] ss:$8 sps:$4 sm:$0xff]  }
 0x1cc   :  { %v1149_v20 = vadd.f32 %v1148_v19, %v3766_v10  ;;  %v1150_v21 = vpop.f32.mrb[10].mxu1  ;;  %v1914_v22 = vpop.f32.mrb[8].mxu0  ;;  %v3519_v10 = vld [vmem:[%s3868_s7 + $0x48] sm:$0xff]   ;;  %3007 = vmatpush3.bf16.msra.mxu1 %v3518_v7 }
 0x1cd   :  { %v3775_v23 = vadd.f32 %v1914_v22, %v1147_v4  ;;  %v1151_v24 = vpop.f32.mrb[11].mxu1  ;;  %v1916_v25 = vpop.f32.mrb[9].mxu0  ;;  %3008 = vmatprep.subr.bf16.mxu1 %v3519_v10  ;;  %v3502_v4 = vld [vmem:[#allocation6 + $0x1b0] ss:$8 sps:$4 sm:$0xff]   ;;  %v3507_v19 = vld [vmem:[#allocation6 + $0x1c4] ss:$8 sps:$4 sm:$0xff]  }
 0x1ce   :  { %v3777_v26 = vadd.f32 %v1916_v25, %v1149_v20  ;;  %v1918_v27 = vpop.f32.mrb[10].mxu0  ;;  %v3505_v20 = vld [vmem:[#allocation6 + $0x1c0] ss:$8 sps:$4 sm:$0xff]   ;;  %v3510_v21 = vld [vmem:[#allocation6 + $0x1d4] ss:$8 sps:$4 sm:$0xff]   ;;  %v1974_v22 = vsub.s32 2, %v3815_v38 }
 0x1cf   :  { %v1919_v28 = vpop.f32.mrb[11].mxu0  ;;  %v3508_v24 = vld [vmem:[#allocation6 + $0x1d0] ss:$8 sps:$4 sm:$0xff]   ;;  %v1978_v25 = vsub.s32 3, %v3815_v38  ;;  %v3513_v27 = vld [vmem:[#allocation6 + $0x1e4] ss:$8 sps:$4 sm:$0xff]  }
 0x1d0   :  { %3009 = vmatpush3.bf16.msra.mxu1 %v3520_v13  ;;  %v1975_v28 = vrot.slane %v3821_v40, %v1974_v22  ;;  %v3511_v10 = vld [vmem:[#allocation6 + $0x1e0] ss:$8 sps:$4 sm:$0xff]  }
 0x1d1   :  { %3010 = vmatprep.subr.bf16.mxu1 %v3521_v30  ;;  %v1979_v7 = vrot.slane %v3821_v40, %v1978_v25 }
 0x1d4   :  { %3011 = vmatpush3.bf16.msra.mxu1 %v3522_v31  ;;  %v3516_v31 = vld [vmem:[#allocation6 + $0x1f4] ss:$8 sps:$4 sm:$0xff]  }
 0x1d5   :  { %3012 = vmatprep.subr.bf16.mxu1 %v3523_v32 }
 0x1d8   :  { %3013 = vmatpush3.bf16.msra.mxu1 %v3524_v16 }
 0x1d9   :  { %3014 = vmatprep.subr.bf16.mxu1 %v3525_v33 }
 0x1dc   :  { %3015 = vmatpush3.bf16.msra.mxu1 %v3526_v34 }
 0x1dd   :  { %3016 = vmatprep.subr.bf16.mxu1 %v3527_v35 }
 0x1e0   :  { %3017 = vmatpush3.bf16.msra.mxu1 %v3528_v36  ;;  %v3514_v36 = vld [vmem:[#allocation6 + $0x1f0] ss:$8 sps:$4 sm:$0xff]  }
 0x20a   :  { %v1873_v43 = vpop.f32.mrb[12].mxu1 }
 0x20b   :  { %v1874_v45 = vadd.f32 %v1873_v43, %v1833_v6  ;;  %v1875_v46 = vpop.f32.mrb[13].mxu1  ;;  %v3487_v6 = vld [vmem:[#allocation6 + $0x160] ss:$8 sps:$4 sm:$0xff]  }
 0x20c   :  { %v1876_v47 = vadd.f32 %v1875_v46, %v1835_v11  ;;  %v1877_v48 = vpop.f32.mrb[14].mxu1  ;;  %v3495_v11 = vld [vmem:[#allocation6 + $0x184] ss:$8 sps:$4 sm:$0xff]   ;;  %v2060_v46 = vld [vmem:[%s3867_s6] sm:$0x3] }
 0x20d   :  { %v1984_v49 = vadd.f32 %v1967_v42, %v1874_v45  ;;  %v1878_v50 = vpop.f32.mrb[15].mxu1  ;;  %v3532_v45 = vld [vmem:[%s3868_s7 + $0x38] sm:$0xff]   ;;  %v2069_v48 = vrot.slane %v2060_v46, %v1970_v41 }
 0x20e   :  { %v1985_v51 = vadd.f32 %v1971_v44, %v1876_v47  ;;  %v3531_v44 = vld [vmem:[%s3868_s7 + $0x78] sm:$0xff]   ;;  %v2065_v47 = vrot.slane %v2060_v46, %v1966_v39  ;;  %v2989_v39 = vld [vmem:[%s3869_s8] ss:$0 sm:$0xff] }
 0x20f   :  { %v1988_v52 = vmax.f32 %v1984_v49, 0.0 }
 0x210   :  { %v1989_v53 = vmax.f32 %v1985_v51, 0.0 }
 0x211   :  { %v1992_v57 = vpack.c.bf16 %v1988_v52, %v1988_v52 }
 0x212   :  { %v1993_v55 = vpack.c.bf16 %v1989_v53, %v1989_v53 }
 0x214   :  { %2424 = vmatprep.mubr.bf16.mxu0 %v1993_v55 }
 0x215   :  { %2425 = vmatmul.mubr.bf16.vlgmr.msra.gmra.mrb[12].mxu0 %v1992_v57 }
 0x216   :  { %2434 = vmatpush1.bf16.msra.mxu0 %v3469_v56 }
 0x217   :  { %2435 = vmatprep.subr.bf16.mxu0 %v3474_v58 }
 0x21a   :  { %2436 = vmatpush1.bf16.msra.mxu0 %v3472_v59 }
 0x21b   :  { %2437 = vmatprep.subr.bf16.mxu0 %v3477_v60 }
 0x21e   :  { %2438 = vmatpush1.bf16.msra.mxu0 %v3475_v61 }
 0x21f   :  { %2439 = vmatprep.subr.bf16.mxu0 %v3480_v62 }
 0x222   :  { %2440 = vmatpush1.bf16.msra.mxu0 %v3478_v63 }
 0x223   :  { %2441 = vmatprep.subr.bf16.mxu0 %v3483_v0 }
 0x226   :  { %2442 = vmatpush1.bf16.msra.mxu0 %v3481_v1 }
 0x227   :  { %2443 = vmatprep.subr.bf16.mxu0 %v3486_v54 }
 0x22a   :  { %2444 = vmatpush1.bf16.msra.mxu0 %v3484_v2 }
 0x22b   :  { %2445 = vmatprep.subr.bf16.mxu0 %v3489_v5 }
 0x22e   :  { %2446 = vmatpush1.bf16.msra.mxu0 %v3487_v6 }
 0x22f   :  { %2447 = vmatprep.subr.bf16.mxu0 %v3492_v8 }
 0x232   :  { %2448 = vmatpush1.bf16.msra.mxu0 %v3490_v9 }
 0x233   :  { %2449 = vmatprep.subr.bf16.mxu0 %v3495_v11 }
 0x236   :  { %2450 = vmatpush1.bf16.msra.mxu0 %v3493_v12 }
 0x237   :  { %2451 = vmatprep.subr.bf16.mxu0 %v3498_v14 }
 0x23a   :  { %2452 = vmatpush1.bf16.msra.mxu0 %v3496_v15 }
 0x23b   :  { %2453 = vmatprep.subr.bf16.mxu0 %v3501_v17 }
 0x23e   :  { %2454 = vmatpush1.bf16.msra.mxu0 %v3499_v3 }
 0x23f   :  { %2455 = vmatprep.subr.bf16.mxu0 %v3504_v18 }
 0x242   :  { %2456 = vmatpush1.bf16.msra.mxu0 %v3502_v4 }
 0x243   :  { %2457 = vmatprep.subr.bf16.mxu0 %v3507_v19 }
 0x246   :  { %2458 = vmatpush1.bf16.msra.mxu0 %v3505_v20 }
 0x247   :  { %2459 = vmatprep.subr.bf16.mxu0 %v3510_v21 }
 0x24a   :  { %v1955_v29 = vpop.f32.mrb[16].mxu1  ;;  %2460 = vmatpush1.bf16.msra.mxu0 %v3508_v24 }
 0x24b   :  { %v1956_v13 = vadd.f32 %v1955_v29, %v3775_v23  ;;  %v1957_v30 = vpop.f32.mrb[17].mxu1  ;;  %2461 = vmatprep.subr.bf16.mxu0 %v3513_v27  ;;  %v3529_v23 = vld [vmem:[%s3868_s7 + $0x70] sm:$0xff]  }
 0x24c   :  { %v1958_v32 = vadd.f32 %v1957_v30, %v3777_v26  ;;  %v1959_v16 = vpop.f32.mrb[18].mxu1  ;;  %v3530_v26 = vld [vmem:[%s3868_s7 + $0x30] sm:$0xff]   ;;  %3018 = vmatprep.subr.bf16.mxu1 %v3529_v23 }
 0x24d   :  { %v1986_v33 = vadd.f32 %v1975_v28, %v1956_v13  ;;  %v1960_v34 = vpop.f32.mrb[19].mxu1  ;;  %3019 = vmatpush3.bf16.msra.mxu1 %v3530_v26 }
 0x24e   :  { %v1987_v35 = vadd.f32 %v1979_v7, %v1958_v32  ;;  %2462 = vmatpush1.bf16.msra.mxu0 %v3511_v10  ;;  %3020 = vmatprep.subr.bf16.mxu1 %v3531_v44 }
 0x24f   :  { %v1990_v37 = vmax.f32 %v1986_v33, 0.0  ;;  %2463 = vmatprep.subr.bf16.mxu0 %v3516_v31 }
 0x250   :  { %v1991_v42 = vmax.f32 %v1987_v35, 0.0 }
 0x251   :  { %v1994_v40 = vpack.c.bf16 %v1990_v37, %v1990_v37  ;;  %3021 = vmatpush3.bf16.msra.mxu1 %v3532_v45 }
 0x252   :  { %v1995_v43 = vpack.c.bf16 %v1991_v42, %v1991_v42  ;;  %2464 = vmatpush1.bf16.msra.mxu0 %v3514_v36 }
 0x254   :  { %2465 = vmatprep.mubr.bf16.mxu0 %v1995_v43 }
 0x255   :  { %2466 = vmatmul.mubr.bf16.vlgmr.msra.gmra.mrb[12].mxu0 %v1994_v40 }
 0x328   :  { %v2467_v49 = vpop.f32.mrb[12].mxu0 }
 0x329   :  { %v3028_v50 = vadd.f32 %v2467_v49, %v2065_v47  ;;  %v2469_v51 = vpop.f32.mrb[13].mxu0 }
 0x32a   :  { %v3029_v52 = vadd.f32 %v2469_v51, %v2069_v48  ;;  %v2471_v53 = vpop.f32.mrb[14].mxu0 }
 0x32b   :  { %v2474_v55 = vmax.f32 %v3028_v50, 0.0  ;;  %v2472_v56 = vpop.f32.mrb[15].mxu0 }
 0x32c   :  { %v2475_v57 = vmax.f32 %v3029_v52, 0.0 }
 0x32d   :  { %v2476_v59 = vpack.c.bf16 %v2474_v55, %v2474_v55 }
 0x32e   :  { %v2477_v58 = vpack.c.bf16 %v2475_v57, %v2475_v57 }
 0x330   :  { %2645 = vmatprep.mubr.bf16.mxu1 %v2477_v58 }
 0x331   :  { %2646 = vmatmul.mubr.bf16.vlgmr.msra.gmra.mrb[20].mxu1 %v2476_v59 }
 0x404   :  { %v3022_v60 = vpop.f32.mrb[20].mxu1 }
 0x405   :  { %v3023_v61 = vpop.f32.mrb[21].mxu1 }
 0x406   :  { %v3024_v38 = vadd.f32 %v3023_v61, %v3022_v60  ;;  %v3025_v41 = vpop.f32.mrb[22].mxu1 }
 0x407   :  { %v3026_v62 = vpop.f32.mrb[23].mxu1 }
 0x408   :  { %v2648_v63 = vadd.f32 %v3024_v38, %v2989_v39 }
 0x40a   :  { %2654 = vst.msk [vmem:[%s3870_s9] sm:$0xff] %vm2653_vm2, %v2648_v63 }
 0x40b   :  { %2659 = vsyncpa [#allocation3], 1 }
 0x40c   :  { %2660 = vsyncpa [#allocation5], 1 }

</bundles_post_ra>
